<compile_context>
chip_gen: v7x
topology: tpu7x:2x2x1
jax: 0.10.0
libtpu: 0.0.40
codegen_flags: <defaults>
</compile_context>

<pallas_src>
import functools

import jax
import jax.numpy as jnp
import numpy as np
from jax import lax
from jax.experimental import pallas as pl
from jax.experimental.pallas import tpu as pltpu


def spectral_norm_kernel(w_ref, u_ref, out_ref, u_out_ref, inv_sigma_ref,
                         *, num_iters, eps, tile_m):
    i = pl.program_id(0)

    @pl.when(i == 0)
    def _power_iteration():
        W = w_ref[...].astype(jnp.float32)          # (M, N), resident in VMEM
        u = u_ref[...]                              # (1, N) f32 row vector
        sigma_sq = jnp.zeros((1, 1), jnp.float32)
        # num_iters is a static Python int -> fully unrolled (serial chain,
        # keep it visible to the LLO scheduler).
        for _ in range(num_iters):
            # v = normalize(W @ u): lane reduce, no transpose of W.
            Wu = jnp.sum(W * u, axis=1, keepdims=True)              # (M, 1)
            vsq = jnp.sum(Wu * Wu, axis=0, keepdims=True)           # (1, 1)
            # 1/max(||x||,1e-12) == rsqrt(max(||x||^2, 1e-24))
            v = Wu * lax.rsqrt(jnp.maximum(vsq, 1e-24))             # (M, 1)
            # u = normalize(W.T @ v): sublane reduce, no transpose of W.
            Wtv = jnp.sum(W * v, axis=0, keepdims=True)             # (1, N)
            usq = jnp.sum(Wtv * Wtv, axis=1, keepdims=True)         # (1, 1)
            u = Wtv * lax.rsqrt(jnp.maximum(usq, 1e-24))            # (1, N)
            sigma_sq = usq
        # sigma = v . (W @ u_new) = ||W^T v||_2  (raw norm, no 1e-12 clamp),
        # so no extra pass over W is needed.
        sigma = jnp.sqrt(sigma_sq)                                  # (1, 1)
        inv_sigma_ref[...] = 1.0 / (sigma + eps)
        u_out_ref[...] = u.astype(u_out_ref.dtype)

    # Row-tiled scale pass; writeback of tile i-1 overlaps the multiply of
    # tile i (out BlockSpec advances per step, W stays resident).
    start = pl.multiple_of(i * tile_m, tile_m)
    w_tile = w_ref[pl.ds(start, tile_m), :].astype(jnp.float32)
    out_ref[...] = (w_tile * inv_sigma_ref[...]).astype(out_ref.dtype)


def _pick_tile_m(M):
    # Largest power-of-two divisor of M (<= 512, and < M so the output
    # writeback is actually pipelined); must be a multiple of 8 for tiling.
    for t in (512, 256, 128, 64, 32, 16, 8):
        if t < M and M % t == 0:
            return t
    return M


def _vmem_limit_bytes(resident_bytes):
    try:
        cap = pltpu.get_tpu_info().vmem_capacity_bytes
    except Exception:
        cap = 64 << 20          # conservative fallback (v7x physical VMEM)
    # ~15% headroom for Mosaic internal scratch.
    want = max(resident_bytes + (4 << 20), 16 << 20)
    return int(min(int(cap * 0.85), want))


def spectral_norm(W, u, num_iters, eps=1e-5):
    """W: (M, N), u: (N,)  ->  (W / (sigma + eps) in W.dtype, updated u (f32))."""
    assert num_iters >= 1, "SpectralNorm requires num_iters >= 1 (v undefined otherwise)"
    M, N = W.shape
    out_dtype = W.dtype
    u_row = u.reshape(1, N).astype(jnp.float32)

    tile_m = _pick_tile_m(M)
    grid = (M // tile_m,)

    w_bytes = M * N * np.dtype(W.dtype).itemsize
    tile_bytes = tile_m * N * np.dtype(out_dtype).itemsize
    # Assume up to 2 buffers for the resident W block + 2 output tile buffers.
    vmem_limit = _vmem_limit_bytes(2 * w_bytes + 2 * tile_bytes)

    kernel = functools.partial(spectral_norm_kernel,
                               num_iters=num_iters, eps=eps, tile_m=tile_m)

    out, u_new = pl.pallas_call(
        kernel,
        grid=grid,
        in_specs=[pl.BlockSpec((M, N), lambda i: (0, 0)),     # W, resident
                  pl.BlockSpec((1, N), lambda i: (0, 0))],    # u row
        out_specs=[pl.BlockSpec((tile_m, N), lambda i: (i, 0)),   # scaled W tiles
                   pl.BlockSpec((1, N), lambda i: (0, 0))],       # updated u
        out_shape=(jax.ShapeDtypeStruct((M, N), out_dtype),
                   jax.ShapeDtypeStruct((1, N), jnp.float32)),
        scratch_shapes=[pltpu.VMEM((1, 1), jnp.float32)],     # 1/(sigma+eps)
        compiler_params=pltpu.CompilerParams(
            dimension_semantics=("arbitrary",),   # step 0 produces sigma for all steps
            vmem_limit_bytes=vmem_limit),
        cost_estimate=pl.CostEstimate(
            flops=int((4 * num_iters + 2) * M * N),
            transcendentals=int(2 * num_iters + 1),
            bytes_accessed=int(2 * w_bytes + 3 * 4 * N)),
    )(W, u_row)
    return out, u_new.reshape(N)


if __name__ == "__main__":
    # Module config: SpectralNorm(num_features=128, num_iters=3, eps=1e-5).
    # num_features is lane-aligned; M is the row count of the weight passed
    # to forward.
    num_features = 128
    num_iters = 3
    eps = 1e-5
    M = 256

    key = jax.random.PRNGKey(0)
    k_w, k_u = jax.random.split(key)
    W = jax.random.normal(k_w, (M, num_features), dtype=jnp.float32)
    u = jax.random.normal(k_u, (num_features,), dtype=jnp.float32)   # self.u

    out, u_new = spectral_norm(W, u, num_iters, eps)
    jax.block_until_ready((out, u_new))

    # float64 numpy reference of the same math (torch semantics).
    def ref(W_in, u_in):
        Wd = np.asarray(W_in, np.float64)
        ud = np.asarray(u_in, np.float64)

        def l2n(x, e=1e-12):
            return x / max(np.linalg.norm(x), e)

        v = None
        for _ in range(num_iters):
            v = l2n(Wd @ ud)
            ud = l2n(Wd.T @ v)
        sigma = v @ (Wd @ ud)
        return Wd / (sigma + eps), ud

    exp_out, exp_u = ref(W, u)
    np.testing.assert_allclose(np.asarray(out), exp_out, rtol=1e-4, atol=1e-5)
    np.testing.assert_allclose(np.asarray(u_new), exp_u, rtol=1e-4, atol=1e-5)

    print("KERNEL_OK")
</pallas_src>

<mosaic_0001>
module attributes {stable_mosaic.version = 11 : i64} {
  func.func @spectral_norm_kernel(%arg0: i32, %arg1: memref<256x128xf32, #tpu.memory_space<vmem>>, %arg2: memref<1x128xf32, #tpu.memory_space<vmem>>, %arg3: memref<128x128xf32, #tpu.memory_space<vmem>>, %arg4: memref<1x128xf32, #tpu.memory_space<vmem>>, %arg5: memref<1x1xf32, #tpu.memory_space<vmem>>) attributes {dimension_semantics = [#tpu.dimension_semantics<arbitrary>], iteration_bounds = array<i64: 2>, scalar_prefetch = 0 : i64, scratch_operands = 1 : i64, tpu.core_type = #tpu.core_type<tc>, window_params = [{pipeline_mode = #tpu.pipeline_mode<synchronous>, transform_indices = @transform_0, window_bounds = array<i64: 256, 128>}, {pipeline_mode = #tpu.pipeline_mode<synchronous>, transform_indices = @transform_1, window_bounds = array<i64: 1, 128>}, {transform_indices = @transform_2, window_bounds = array<i64: 128, 128>}, {pipeline_mode = #tpu.pipeline_mode<synchronous>, transform_indices = @transform_3, window_bounds = array<i64: 1, 128>}]} {
    %c0_i32 = arith.constant 0 : i32
    %0 = arith.cmpi eq, %arg0, %c0_i32 : i32
    %1 = arith.extui %0 : i1 to i32
    %c0_i32_0 = arith.constant 0 : i32
    %2 = arith.cmpi ne, %1, %c0_i32_0 : i32
    scf.if %2 {
      %c0_5 = arith.constant 0 : index
      %c0_6 = arith.constant 0 : index
      %11 = vector.load %arg1[%c0_5, %c0_6] : memref<256x128xf32, #tpu.memory_space<vmem>>, vector<256x128xf32>
      %c0_7 = arith.constant 0 : index
      %c0_8 = arith.constant 0 : index
      %12 = vector.load %arg2[%c0_7, %c0_8] : memref<1x128xf32, #tpu.memory_space<vmem>>, vector<1x128xf32>
      %13 = vector.broadcast %12 : vector<1x128xf32> to vector<256x128xf32>
      %14 = arith.mulf %11, %13 : vector<256x128xf32>
      %cst = arith.constant dense<0.000000e+00> : vector<256xf32>
      %15 = vector.multi_reduction <add>, %14, %cst [1] : vector<256x128xf32> to vector<256xf32>
      %16 = vector.shape_cast %15 : vector<256xf32> to vector<256x1xf32>
      %17 = arith.mulf %16, %16 : vector<256x1xf32>
      %cst_9 = arith.constant dense<0.000000e+00> : vector<1xf32>
      %18 = vector.multi_reduction <add>, %17, %cst_9 [0] : vector<256x1xf32> to vector<1xf32>
      %19 = vector.shape_cast %18 : vector<1xf32> to vector<1x1xf32>
      %cst_10 = arith.constant 1.000000e-24 : f32
      %20 = vector.broadcast %cst_10 : f32 to vector<1x1xf32>
      %21 = arith.maximumf %19, %20 : vector<1x1xf32>
      %22 = math.rsqrt %21 : vector<1x1xf32>
      %23 = vector.broadcast %22 : vector<1x1xf32> to vector<256x1xf32>
      %24 = arith.mulf %16, %23 : vector<256x1xf32>
      %25 = vector.broadcast %24 : vector<256x1xf32> to vector<256x128xf32>
      %26 = arith.mulf %11, %25 : vector<256x128xf32>
      %cst_11 = arith.constant dense<0.000000e+00> : vector<128xf32>
      %27 = vector.multi_reduction <add>, %26, %cst_11 [0] : vector<256x128xf32> to vector<128xf32>
      %28 = vector.shape_cast %27 : vector<128xf32> to vector<1x128xf32>
      %29 = arith.mulf %28, %28 : vector<1x128xf32>
      %cst_12 = arith.constant dense<0.000000e+00> : vector<1xf32>
      %30 = vector.multi_reduction <add>, %29, %cst_12 [1] : vector<1x128xf32> to vector<1xf32>
      %31 = vector.shape_cast %30 : vector<1xf32> to vector<1x1xf32>
      %cst_13 = arith.constant 1.000000e-24 : f32
      %32 = vector.broadcast %cst_13 : f32 to vector<1x1xf32>
      %33 = arith.maximumf %31, %32 : vector<1x1xf32>
      %34 = math.rsqrt %33 : vector<1x1xf32>
      %35 = vector.broadcast %34 : vector<1x1xf32> to vector<1x128xf32>
      %36 = arith.mulf %28, %35 : vector<1x128xf32>
      %37 = vector.broadcast %36 : vector<1x128xf32> to vector<256x128xf32>
      %38 = arith.mulf %11, %37 : vector<256x128xf32>
      %cst_14 = arith.constant dense<0.000000e+00> : vector<256xf32>
      %39 = vector.multi_reduction <add>, %38, %cst_14 [1] : vector<256x128xf32> to vector<256xf32>
      %40 = vector.shape_cast %39 : vector<256xf32> to vector<256x1xf32>
      %41 = arith.mulf %40, %40 : vector<256x1xf32>
      %cst_15 = arith.constant dense<0.000000e+00> : vector<1xf32>
      %42 = vector.multi_reduction <add>, %41, %cst_15 [0] : vector<256x1xf32> to vector<1xf32>
      %43 = vector.shape_cast %42 : vector<1xf32> to vector<1x1xf32>
      %cst_16 = arith.constant 1.000000e-24 : f32
      %44 = vector.broadcast %cst_16 : f32 to vector<1x1xf32>
      %45 = arith.maximumf %43, %44 : vector<1x1xf32>
      %46 = math.rsqrt %45 : vector<1x1xf32>
      %47 = vector.broadcast %46 : vector<1x1xf32> to vector<256x1xf32>
      %48 = arith.mulf %40, %47 : vector<256x1xf32>
      %49 = vector.broadcast %48 : vector<256x1xf32> to vector<256x128xf32>
      %50 = arith.mulf %11, %49 : vector<256x128xf32>
      %cst_17 = arith.constant dense<0.000000e+00> : vector<128xf32>
      %51 = vector.multi_reduction <add>, %50, %cst_17 [0] : vector<256x128xf32> to vector<128xf32>
      %52 = vector.shape_cast %51 : vector<128xf32> to vector<1x128xf32>
      %53 = arith.mulf %52, %52 : vector<1x128xf32>
      %cst_18 = arith.constant dense<0.000000e+00> : vector<1xf32>
      %54 = vector.multi_reduction <add>, %53, %cst_18 [1] : vector<1x128xf32> to vector<1xf32>
      %55 = vector.shape_cast %54 : vector<1xf32> to vector<1x1xf32>
      %cst_19 = arith.constant 1.000000e-24 : f32
      %56 = vector.broadcast %cst_19 : f32 to vector<1x1xf32>
      %57 = arith.maximumf %55, %56 : vector<1x1xf32>
      %58 = math.rsqrt %57 : vector<1x1xf32>
      %59 = vector.broadcast %58 : vector<1x1xf32> to vector<1x128xf32>
      %60 = arith.mulf %52, %59 : vector<1x128xf32>
      %61 = vector.broadcast %60 : vector<1x128xf32> to vector<256x128xf32>
      %62 = arith.mulf %11, %61 : vector<256x128xf32>
      %cst_20 = arith.constant dense<0.000000e+00> : vector<256xf32>
      %63 = vector.multi_reduction <add>, %62, %cst_20 [1] : vector<256x128xf32> to vector<256xf32>
      %64 = vector.shape_cast %63 : vector<256xf32> to vector<256x1xf32>
      %65 = arith.mulf %64, %64 : vector<256x1xf32>
      %cst_21 = arith.constant dense<0.000000e+00> : vector<1xf32>
      %66 = vector.multi_reduction <add>, %65, %cst_21 [0] : vector<256x1xf32> to vector<1xf32>
      %67 = vector.shape_cast %66 : vector<1xf32> to vector<1x1xf32>
      %cst_22 = arith.constant 1.000000e-24 : f32
      %68 = vector.broadcast %cst_22 : f32 to vector<1x1xf32>
      %69 = arith.maximumf %67, %68 : vector<1x1xf32>
      %70 = math.rsqrt %69 : vector<1x1xf32>
      %71 = vector.broadcast %70 : vector<1x1xf32> to vector<256x1xf32>
      %72 = arith.mulf %64, %71 : vector<256x1xf32>
      %73 = vector.broadcast %72 : vector<256x1xf32> to vector<256x128xf32>
      %74 = arith.mulf %11, %73 : vector<256x128xf32>
      %cst_23 = arith.constant dense<0.000000e+00> : vector<128xf32>
      %75 = vector.multi_reduction <add>, %74, %cst_23 [0] : vector<256x128xf32> to vector<128xf32>
      %76 = vector.shape_cast %75 : vector<128xf32> to vector<1x128xf32>
      %77 = arith.mulf %76, %76 : vector<1x128xf32>
      %cst_24 = arith.constant dense<0.000000e+00> : vector<1xf32>
      %78 = vector.multi_reduction <add>, %77, %cst_24 [1] : vector<1x128xf32> to vector<1xf32>
      %79 = vector.shape_cast %78 : vector<1xf32> to vector<1x1xf32>
      %cst_25 = arith.constant 1.000000e-24 : f32
      %80 = vector.broadcast %cst_25 : f32 to vector<1x1xf32>
      %81 = arith.maximumf %79, %80 : vector<1x1xf32>
      %82 = math.rsqrt %81 : vector<1x1xf32>
      %83 = vector.broadcast %82 : vector<1x1xf32> to vector<1x128xf32>
      %84 = arith.mulf %76, %83 : vector<1x128xf32>
      %85 = math.sqrt %79 : vector<1x1xf32>
      %cst_26 = arith.constant 9.99999974E-6 : f32
      %86 = vector.broadcast %cst_26 : f32 to vector<1x1xf32>
      %87 = arith.addf %85, %86 : vector<1x1xf32>
      %cst_27 = arith.constant 1.000000e+00 : f32
      %88 = vector.broadcast %cst_27 : f32 to vector<1x1xf32>
      %89 = arith.divf %88, %87 : vector<1x1xf32>
      %c0_28 = arith.constant 0 : index
      %c0_29 = arith.constant 0 : index
      %90 = vector.load %arg5[%c0_28, %c0_29] : memref<1x1xf32, #tpu.memory_space<vmem>>, vector<1x1xf32>
      tpu.vector_store %arg5[%c0_28, %c0_29], %89 {strides = array<i32>} : memref<1x1xf32, #tpu.memory_space<vmem>>, vector<1x1xf32>,
      %c0_30 = arith.constant 0 : index
      %c0_31 = arith.constant 0 : index
      %91 = vector.load %arg4[%c0_30, %c0_31] : memref<1x128xf32, #tpu.memory_space<vmem>>, vector<1x128xf32>
      tpu.vector_store %arg4[%c0_30, %c0_31], %84 {strides = array<i32>} : memref<1x128xf32, #tpu.memory_space<vmem>>, vector<1x128xf32>,
    } else {
    }
    %c128_i32 = arith.constant 128 : i32
    %3 = arith.muli %arg0, %c128_i32 : i32
    %4 = tpu.assume_multiple %3, 128 : i32
    %5 = arith.index_cast %4 : i32 to index
    %c0 = arith.constant 0 : index
    %6 = vector.load %arg1[%5, %c0] : memref<256x128xf32, #tpu.memory_space<vmem>>, vector<128x128xf32>
    %c0_1 = arith.constant 0 : index
    %c0_2 = arith.constant 0 : index
    %7 = vector.load %arg5[%c0_1, %c0_2] : memref<1x1xf32, #tpu.memory_space<vmem>>, vector<1x1xf32>
    %8 = vector.broadcast %7 : vector<1x1xf32> to vector<128x128xf32>
    %9 = arith.mulf %6, %8 : vector<128x128xf32>
    %c0_3 = arith.constant 0 : index
    %c0_4 = arith.constant 0 : index
    %10 = vector.load %arg3[%c0_3, %c0_4] : memref<128x128xf32, #tpu.memory_space<vmem>>, vector<128x128xf32>
    tpu.vector_store %arg3[%c0_3, %c0_4], %9 {strides = array<i32>} : memref<128x128xf32, #tpu.memory_space<vmem>>, vector<128x128xf32>,
    return
  }
  func.func @transform_0(%arg0: i32) -> (i32, i32) {
    %c0_i32 = arith.constant 0 : i32
    %c0_i32_0 = arith.constant 0 : i32
    %c0_i32_1 = arith.constant 0 : i32
    return %c0_i32, %c0_i32_0 : i32, i32
  }
  func.func @transform_1(%arg0: i32) -> (i32, i32) {
    %c0_i32 = arith.constant 0 : i32
    %c0_i32_0 = arith.constant 0 : i32
    %c0_i32_1 = arith.constant 0 : i32
    return %c0_i32, %c0_i32_0 : i32, i32
  }
  func.func @transform_2(%arg0: i32) -> (i32, i32) {
    %c0_i32 = arith.constant 0 : i32
    %c0_i32_0 = arith.constant 0 : i32
    return %arg0, %c0_i32 : i32, i32
  }
  func.func @transform_3(%arg0: i32) -> (i32, i32) {
    %c0_i32 = arith.constant 0 : i32
    %c0_i32_0 = arith.constant 0 : i32
    %c0_i32_1 = arith.constant 0 : i32
    return %c0_i32, %c0_i32_0 : i32, i32
  }
}

</mosaic_0001>

<bundles_post_ra>
// kernel: tpu_custom_call.1
= control target key start
LH: loop header
LB: loop body
LE: loop exit
PB: predicated region body
PF: predicated region fallthrough
CT: control target
= control target key end

     0   :  { %9 = vsyncpa [#allocation4], 0  ;;  %s2628_s0 = inlined_call_operand.hbm [shape: f32[256,128], index: 0, kind: input, shape index: {}]   ;;  %s2629_s1 = inlined_call_operand.vmem [shape: f32[1,128], index: 1, kind: input, shape index: {}]   ;;  %s2630_s2 = inlined_call_operand.hbm [shape: f32[256,128], index: 2, kind: output, shape index: {0}]   ;;  %s2631_s3 = inlined_call_operand.hbm [shape: f32[1,128], index: 3, kind: output, shape index: {1}]  }
   0x1   :  { %10 = vsyncpa [#allocation5], 0 }
   0x2   :  { %12 = vsyncpa [#allocation5 + $0x1], 0 }
   0x3   :  { %13 = vsyncpa [#allocation8], 0  ;;  %s1485_s12 = smov 0   ;;  %s1487_s13 = smov 0  }
   0x4   :  { %s1489_s14 = smov 0   ;;  %s1491_s15 = smov 0  }
   0x5 LB: > { %s1506_s16 = sadd.s32 4294967295, %s1455_s15   ;;  %s1202_s17 = sadd.s32 4294967294, %s1455_s15   ;;  %s1455_s15 = sphi %s1491_s15, %s2802_s15   ;;  %s1451_s14 = sphi %s1489_s14, %s2801_s14   ;;  %s1447_s13 = sphi %s1487_s13, %s2800_s13   ;;  %s1443_s12 = sphi %s1485_s12, %s2799_s12  }
   0x6   : > { %s1510_s18 = sadd.s32 1, %s1455_s15   ;;  %s68_s19 = sadd.s32 1, %s1451_s14 }
   0x7   : > { %s65_s20 = ssub.s32 %s1455_s15, %s1510_s18  ;;  %p78_p0 = scmp.ne.s32.totalorder %s1451_s14, %s1447_s13 }
   0x8   : > { %p66_p1 = scmp.eq.s32.totalorder %s65_s20, 0  ;;  %p2632_p2 = scmp.eq.s32.totalorder %s1506_s16, 1 }
   0x9   : > { %p84_p3 = scmp.ne.s32.totalorder %s1447_s13, %s1443_s12  ;;  %p85_p4 = scmp.eq.s32.totalorder %s1202_s17, 1 }
   0xa   : > { %s1521_s21 = scalar_select %p66_p1, %s1451_s14, %s68_s19  }
   0xb   : > { %p1525_p5 = por %p2632_p2, %p78_p0  ;;  %p1529_p6 = por %p85_p4, %p84_p3 }
   0xc   : > { %p1203_p7 = scmp.ge.s32.totalorder %s1455_s15, 1  ;;  %p113_p8 = scmp.lt.s32.totalorder %s1455_s15, 3 }
   0xd   : > { %s2697_s22 = scalar_select %p1525_p5, 1, 0 }
   0xe   : > { %s2698_s23 = scalar_select %p1529_p6, 1, 0 }
   0xf   : > { %p2633_p10 = scmp.eq.s32.totalorder %s1506_s16, 0  ;;  %p1537_p11 = pnand %p1203_p7, %p113_p8 }
  0x10   : > { %s1457_s25 = smov [#allocation3]   ;;  %s1331_s30 = scalar_lea.hbm %s2628_s0, 4096 }
  0x11   : > { %s2699_s24 = scalar_select %p1537_p11, 1, 0 }
  0x12   : > { %s125_s26 = sshll.u32 %s1457_s25, 4  ;;  %p1230_p12 = pneg %p1537_p11  ;;  %s126_s26 = int_to_ptr.vmem [resolvable:$true] %s125_s26 }
  0x13   : > { %p1332_p0 = scmp.ne.s32.totalorder %s2628_s0, %s1331_s30  ;;  %p1338_p7 = scmp.lt.u32.totalorder %s1331_s30, %s2628_s0 }
  0x14   : > { %p1545_p13 = pnand %p2633_p10, %p1230_p12 }
  0x16   : > { %p1333_p1 = pneg %p1545_p13 }
  0x18   : > { %p1334_p3 = pnand %p1333_p1, %p1332_p0 }
  0x1a   : > { %p1335_p4 = pneg %p1334_p3 }
  0x1c   : > { %p1340_p8 = pnand %p1338_p7, %p1335_p4 }
  0x1e   : > { %1343 = shalt.err (!%p1340_p8)
}
  0x1f   : > { %s1344_s8 = scalar_lea.vmem %s126_s26, 4096  ;;  %p1352_p10 = scmp.lt.s32.totalorder %s126_s26, %s126_s26 }
  0x20   : > { %p1345_p12 = scmp.ne.s32.totalorder %s126_s26, %s1344_s8  ;;  %p1353_p6 = scmp.lt.s32.totalorder %s1344_s8, %s1344_s8 }
  0x22   : > { %p1347_p2 = pnand %p1345_p12, %p1333_p1  ;;  %p1354_p5 = por %p1353_p6, %p1352_p10 }
  0x24   : > { %p1348_p9 = pneg %p1347_p2 }
  0x26   : > { %p1355_p11 = pnand %p1354_p5, %p1348_p9 }
  0x28   : > { %1358 = shalt.err (!%p1355_p11)
}
  0x29   : > { %s1458_s9 = smov 128   ;;  %s1459_s10 = smov 8  }
  0x2a   : > { %1233 = dma.hbm_to_vmem [thread:$0]  (!%p1545_p13), %s2628_s0, 4096, %s126_s26, [#allocation4], %s1458_s9, %s1458_s9, %s1459_s10  }
  0x2b   : > { %p2701_p0 = scmp.ne.s32.totalorder %s2699_s24, 0 }
  0x2c   : > { %p2702_p3 = scmp.eq.s32.totalorder (!%p2701_p0), %s1506_s16, 0 }
  0x2d   : > { %144 = sbr.rel (%p2701_p0) target bundleno = 1661 (0x67d), region = 28 }
  0x34   : > { %1430 = dma.done.wait (%p2702_p3), [#allocation4], 4096   ;;  %p2703_p2 = pmov %p2702_p3 }
  0x35   : > { %s158_s19 = sand.u32 1, %s1447_s13   ;;  %p2704_p5 = scmp.ne.s32.totalorder %s1506_s16, 0 }
  0x36   : > { %1432 = vsyncadd (%p2703_p2), [#allocation4], 4294963200  ;;  %s1207_s20 = sshll.u32 %s158_s19, 7 }
  0x37   : > { %s1574_s25 = scalar_lea.vmem [#allocation6], %s1207_s20  ;;  %167 = sbr.rel (%p2704_p5) target bundleno = 1496 (0x5d8), region = 36 }
  0x3e   : > { %v1578_v0 = vld [vmem:[#allocation3] sm:$0xff]  ;;  %v1583_v1 = vld [vmem:[%s2629_s1] ss:$0 sm:$0xff]  ;;  %v1585_v2 = vld [vmem:[#allocation3 + $0x10] sm:$0xff]  ;;  %vm1039_vm2 = vcmask 0  }
  0x3f   : > { %v207_v3 = vmul.f32 %v1583_v1, %v1578_v0  ;;  %v209_v4 = vmul.f32 %v1583_v1, %v1585_v2  ;;  %v1591_v5 = vld [vmem:[#allocation3 + $0x8] sm:$0xff]  ;;  %v1593_v6 = vld [vmem:[#allocation3 + $0x18] sm:$0xff]  ;;  %v1599_v9 = vld [vmem:[#allocation3 + $0x20] sm:$0xff] }
  0x40   : > { %v208_v7 = vmul.f32 %v1583_v1, %v1591_v5  ;;  %v210_v8 = vmul.f32 %v1583_v1, %v1593_v6  ;;  %v1601_v10 = vld [vmem:[#allocation3 + $0x28] sm:$0xff]  ;;  %v211_v11 = vmul.f32 %v1583_v1, %v1599_v9  ;;  %v1607_v13 = vld [vmem:[#allocation3 + $0x30] sm:$0xff]  ;;  %v1609_v14 = vld [vmem:[#allocation3 + $0x38] sm:$0xff] }
  0x41   : > { %239 = vadd.xlane.f32.xlu0 %v207_v3  ;;  %243 = vadd.xlane.f32.xlu1 %v209_v4  ;;  %v212_v12 = vmul.f32 %v1583_v1, %v1601_v10  ;;  %v213_v15 = vmul.f32 %v1583_v1, %v1607_v13  ;;  %v214_v16 = vmul.f32 %v1583_v1, %v1609_v14  ;;  %v1615_v17 = vld [vmem:[#allocation3 + $0x40] sm:$0xff]  ;;  %v1617_v18 = vld [vmem:[#allocation3 + $0x48] sm:$0xff]  ;;  %v1623_v21 = vld [vmem:[#allocation3 + $0x50] sm:$0xff] }
  0x42   : > { %v215_v19 = vmul.f32 %v1583_v1, %v1615_v17  ;;  %v216_v20 = vmul.f32 %v1583_v1, %v1617_v18  ;;  %v1625_v22 = vld [vmem:[#allocation3 + $0x58] sm:$0xff]  ;;  %v217_v23 = vmul.f32 %v1583_v1, %v1623_v21  ;;  %v1631_v25 = vld [vmem:[#allocation3 + $0x60] sm:$0xff]  ;;  %v1633_v26 = vld [vmem:[#allocation3 + $0x68] sm:$0xff] }
  0x43   : > { %v218_v24 = vmul.f32 %v1583_v1, %v1625_v22  ;;  %v219_v27 = vmul.f32 %v1583_v1, %v1631_v25  ;;  %v220_v28 = vmul.f32 %v1583_v1, %v1633_v26  ;;  %v1639_v29 = vld [vmem:[#allocation3 + $0x70] sm:$0xff]  ;;  %v1641_v30 = vld [vmem:[#allocation3 + $0x78] sm:$0xff]  ;;  %v1647_v33 = vld [vmem:[#allocation3 + $0x80] sm:$0xff] }
  0x44   : > { %v221_v31 = vmul.f32 %v1583_v1, %v1639_v29  ;;  %v222_v32 = vmul.f32 %v1583_v1, %v1641_v30  ;;  %v1649_v34 = vld [vmem:[#allocation3 + $0x88] sm:$0xff]  ;;  %v223_v35 = vmul.f32 %v1583_v1, %v1647_v33  ;;  %v1655_v37 = vld [vmem:[#allocation3 + $0x90] sm:$0xff]  ;;  %v1657_v38 = vld [vmem:[#allocation3 + $0x98] sm:$0xff] }
  0x45   : > { %241 = vadd.xlane.f32.xlu0 %v208_v7  ;;  %245 = vadd.xlane.f32.xlu1 %v210_v8  ;;  %v224_v36 = vmul.f32 %v1583_v1, %v1649_v34  ;;  %v225_v39 = vmul.f32 %v1583_v1, %v1655_v37  ;;  %v226_v40 = vmul.f32 %v1583_v1, %v1657_v38  ;;  %v1663_v41 = vld [vmem:[#allocation3 + $0xa0] sm:$0xff]  ;;  %v1665_v42 = vld [vmem:[#allocation3 + $0xa8] sm:$0xff]  ;;  %v1671_v45 = vld [vmem:[#allocation3 + $0xb0] sm:$0xff] }
  0x46   : > { %2705 = vst [vmem:[#allocation12_spill] sm:$0xff] %v1663_v41  ;;  %2706 = vst [vmem:[#allocation13_spill] sm:$0xff] %v1665_v42  ;;  %v227_v43 = vmul.f32 %v1583_v1, %v1663_v41  ;;  %v228_v44 = vmul.f32 %v1583_v1, %v1665_v42  ;;  %v1673_v46 = vld [vmem:[#allocation3 + $0xb8] sm:$0xff]  ;;  %v229_v47 = vmul.f32 %v1583_v1, %v1671_v45  ;;  %v1679_v49 = vld [vmem:[#allocation3 + $0xc0] sm:$0xff] }
  0x47   : > { %2707 = vst [vmem:[#allocation14_spill] sm:$0xff] %v1671_v45  ;;  %2708 = vst [vmem:[#allocation15_spill] sm:$0xff] %v1673_v46  ;;  %v230_v48 = vmul.f32 %v1583_v1, %v1673_v46  ;;  %v1681_v50 = vld [vmem:[#allocation3 + $0xc8] sm:$0xff]  ;;  %v231_v51 = vmul.f32 %v1583_v1, %v1679_v49  ;;  %v1687_v53 = vld [vmem:[#allocation3 + $0xd0] sm:$0xff] }
  0x48   : > { %2709 = vst [vmem:[#allocation16_spill] sm:$0xff] %v1679_v49  ;;  %2710 = vst [vmem:[#allocation17_spill] sm:$0xff] %v1681_v50  ;;  %v232_v52 = vmul.f32 %v1583_v1, %v1681_v50  ;;  %v1689_v54 = vld [vmem:[#allocation3 + $0xd8] sm:$0xff]  ;;  %v233_v55 = vmul.f32 %v1583_v1, %v1687_v53  ;;  %v1695_v57 = vld [vmem:[#allocation3 + $0xe0] sm:$0xff] }
  0x49   : > { %247 = vadd.xlane.f32.xlu0 %v211_v11  ;;  %249 = vadd.xlane.f32.xlu1 %v212_v12  ;;  %2711 = vst [vmem:[#allocation18_spill] sm:$0xff] %v1687_v53  ;;  %2712 = vst [vmem:[#allocation19_spill] sm:$0xff] %v1689_v54  ;;  %v234_v56 = vmul.f32 %v1583_v1, %v1689_v54  ;;  %v1697_v58 = vld [vmem:[#allocation3 + $0xe8] sm:$0xff]  ;;  %v235_v59 = vmul.f32 %v1583_v1, %v1695_v57  ;;  %v1703_v61 = vld [vmem:[#allocation3 + $0xf0] sm:$0xff] }
  0x4a   : > { %2713 = vst [vmem:[#allocation20_spill] sm:$0xff] %v1695_v57  ;;  %2714 = vst [vmem:[#allocation21_spill] sm:$0xff] %v1697_v58  ;;  %v236_v60 = vmul.f32 %v1583_v1, %v1697_v58  ;;  %v1705_v62 = vld [vmem:[#allocation3 + $0xf8] sm:$0xff]  ;;  %v237_v63 = vmul.f32 %v1583_v1, %v1703_v61 }
  0x4b   : > { %2715 = vst [vmem:[#allocation22_spill] sm:$0xff] %v1703_v61  ;;  %2716 = vst [vmem:[#allocation23_spill] sm:$0xff] %v1705_v62  ;;  %v238_v3 = vmul.f32 %v1583_v1, %v1705_v62 }
  0x4d   : > { %251 = vadd.xlane.f32.xlu0 %v213_v15  ;;  %253 = vadd.xlane.f32.xlu1 %v214_v16 }
  0x51   : > { %255 = vadd.xlane.f32.xlu0 %v215_v19  ;;  %257 = vadd.xlane.f32.xlu1 %v216_v20 }
  0x55   : > { %259 = vadd.xlane.f32.xlu0 %v217_v23  ;;  %261 = vadd.xlane.f32.xlu1 %v218_v24 }
  0x59   : > { %263 = vadd.xlane.f32.xlu0 %v219_v27  ;;  %265 = vadd.xlane.f32.xlu1 %v220_v28 }
  0x5d   : > { %267 = vadd.xlane.f32.xlu0 %v221_v31  ;;  %269 = vadd.xlane.f32.xlu1 %v222_v32 }
  0x61   : > { %271 = vadd.xlane.f32.xlu0 %v223_v35  ;;  %273 = vadd.xlane.f32.xlu1 %v224_v36 }
  0x65   : > { %275 = vadd.xlane.f32.xlu0 %v225_v39  ;;  %277 = vadd.xlane.f32.xlu1 %v226_v40 }
  0x69   : > { %279 = vadd.xlane.f32.xlu0 %v227_v43  ;;  %281 = vadd.xlane.f32.xlu1 %v228_v44 }
  0x6d   : > { %283 = vadd.xlane.f32.xlu0 %v229_v47  ;;  %285 = vadd.xlane.f32.xlu1 %v230_v48 }
  0x71   : > { %287 = vadd.xlane.f32.xlu0 %v231_v51  ;;  %289 = vadd.xlane.f32.xlu1 %v232_v52 }
  0x75   : > { %291 = vadd.xlane.f32.xlu0 %v233_v55  ;;  %293 = vadd.xlane.f32.xlu1 %v234_v56 }
  0x79   : > { %295 = vadd.xlane.f32.xlu0 %v235_v59  ;;  %297 = vadd.xlane.f32.xlu1 %v236_v60 }
  0x7d   : > { %299 = vadd.xlane.f32.xlu0 %v237_v63  ;;  %301 = vadd.xlane.f32.xlu1 %v238_v3 }
  0xce   : > { %v1711_v4 = vpop.xlane.xlu0 %239  ;;  %v1713_v7 = vpop.xlane.xlu1 %243 }
  0xcf   : > { %v303_v12 = vmul.f32 %v1711_v4, %v1711_v4  ;;  %v305_v16 = vmul.f32 %v1713_v7, %v1713_v7 }
  0xd2   : > { %v1715_v8 = vpop.xlane.xlu0 %241  ;;  %v1717_v11 = vpop.xlane.xlu1 %245 }
  0xd3   : > { %v304_v15 = vmul.f32 %v1715_v8, %v1715_v8  ;;  %v306_v19 = vmul.f32 %v1717_v11, %v1717_v11 }
  0xd5   : > { %v335_v1 = vadd.f32 %v304_v15, %v303_v12 }
  0xd6   : > { %v1727_v20 = vpop.xlane.xlu0 %247  ;;  %v1729_v23 = vpop.xlane.xlu1 %249 }
  0xd7   : > { %v336_v24 = vadd.f32 %v335_v1, %v305_v16  ;;  %v307_v27 = vmul.f32 %v1727_v20, %v1727_v20  ;;  %v308_v31 = vmul.f32 %v1729_v23, %v1729_v23 }
  0xd9   : > { %v337_v28 = vadd.f32 %v336_v24, %v306_v19 }
  0xda   : > { %v1735_v32 = vpop.xlane.xlu0 %251  ;;  %v1737_v35 = vpop.xlane.xlu1 %253 }
  0xdb   : > { %v338_v36 = vadd.f32 %v337_v28, %v307_v27  ;;  %v309_v39 = vmul.f32 %v1735_v32, %v1735_v32  ;;  %v310_v43 = vmul.f32 %v1737_v35, %v1737_v35 }
  0xdd   : > { %v339_v40 = vadd.f32 %v338_v36, %v308_v31 }
  0xde   : > { %v1743_v44 = vpop.xlane.xlu0 %255  ;;  %v1745_v47 = vpop.xlane.xlu1 %257 }
  0xdf   : > { %v340_v48 = vadd.f32 %v339_v40, %v309_v39  ;;  %v311_v51 = vmul.f32 %v1743_v44, %v1743_v44  ;;  %v312_v55 = vmul.f32 %v1745_v47, %v1745_v47 }
  0xe1   : > { %v341_v52 = vadd.f32 %v340_v48, %v310_v43 }
  0xe2   : > { %v1751_v56 = vpop.xlane.xlu0 %259  ;;  %v1753_v59 = vpop.xlane.xlu1 %261 }
  0xe3   : > { %v342_v60 = vadd.f32 %v341_v52, %v311_v51  ;;  %v313_v63 = vmul.f32 %v1751_v56, %v1751_v56  ;;  %v314_v12 = vmul.f32 %v1753_v59, %v1753_v59 }
  0xe5   : > { %v343_v3 = vadd.f32 %v342_v60, %v312_v55 }
  0xe6   : > { %v1759_v15 = vpop.xlane.xlu0 %263  ;;  %v1761_v16 = vpop.xlane.xlu1 %265 }
  0xe7   : > { %v344_v1 = vadd.f32 %v343_v3, %v313_v63  ;;  %v315_v19 = vmul.f32 %v1759_v15, %v1759_v15  ;;  %v316_v27 = vmul.f32 %v1761_v16, %v1761_v16 }
  0xe9   : > { %v345_v24 = vadd.f32 %v344_v1, %v314_v12 }
  0xea   : > { %v1767_v28 = vpop.xlane.xlu0 %267  ;;  %v1769_v31 = vpop.xlane.xlu1 %269 }
  0xeb   : > { %v346_v36 = vadd.f32 %v345_v24, %v315_v19  ;;  %v317_v39 = vmul.f32 %v1767_v28, %v1767_v28  ;;  %v318_v43 = vmul.f32 %v1769_v31, %v1769_v31 }
  0xed   : > { %v347_v40 = vadd.f32 %v346_v36, %v316_v27 }
  0xee   : > { %v1775_v48 = vpop.xlane.xlu0 %271  ;;  %v1777_v51 = vpop.xlane.xlu1 %273 }
  0xef   : > { %v348_v52 = vadd.f32 %v347_v40, %v317_v39  ;;  %v319_v55 = vmul.f32 %v1775_v48, %v1775_v48  ;;  %v320_v63 = vmul.f32 %v1777_v51, %v1777_v51 }
  0xf1   : > { %v349_v60 = vadd.f32 %v348_v52, %v318_v43 }
  0xf2   : > { %v1783_v3 = vpop.xlane.xlu0 %275  ;;  %v1785_v12 = vpop.xlane.xlu1 %277 }
  0xf3   : > { %v350_v1 = vadd.f32 %v349_v60, %v319_v55  ;;  %v321_v19 = vmul.f32 %v1783_v3, %v1783_v3  ;;  %v322_v27 = vmul.f32 %v1785_v12, %v1785_v12 }
  0xf5   : > { %v351_v24 = vadd.f32 %v350_v1, %v320_v63 }
  0xf6   : > { %v1791_v36 = vpop.xlane.xlu0 %279  ;;  %v1793_v39 = vpop.xlane.xlu1 %281 }
  0xf7   : > { %v352_v40 = vadd.f32 %v351_v24, %v321_v19  ;;  %v323_v43 = vmul.f32 %v1791_v36, %v1791_v36  ;;  %v324_v62 = vmul.f32 %v1793_v39, %v1793_v39 }
  0xf9   : > { %v353_v52 = vadd.f32 %v352_v40, %v322_v27 }
  0xfa   : > { %v1799_v55 = vpop.xlane.xlu0 %283  ;;  %v1801_v60 = vpop.xlane.xlu1 %285 }
  0xfb   : > { %2717 = vst [vmem:[#allocation24_spill] sm:$0xff] %v1801_v60  ;;  %v354_v63 = vadd.f32 %v353_v52, %v323_v43  ;;  %v325_v1 = vmul.f32 %v1799_v55, %v1799_v55  ;;  %v326_v58 = vmul.f32 %v1801_v60, %v1801_v60 }
  0xfd   : > { %v355_v61 = vadd.f32 %v354_v63, %v324_v62 }
  0xfe   : > { %v1807_v19 = vpop.xlane.xlu0 %287  ;;  %v1809_v24 = vpop.xlane.xlu1 %289 }
  0xff   : > { %2718 = vst [vmem:[#allocation25_spill] sm:$0xff] %v1807_v19  ;;  %2719 = vst [vmem:[#allocation26_spill] sm:$0xff] %v1809_v24  ;;  %v356_v27 = vadd.f32 %v355_v61, %v325_v1  ;;  %v327_v40 = vmul.f32 %v1807_v19, %v1807_v19  ;;  %v328_v54 = vmul.f32 %v1809_v24, %v1809_v24 }
 0x101   : > { %v357_v57 = vadd.f32 %v356_v27, %v326_v58 }
 0x102   : > { %v1815_v43 = vpop.xlane.xlu0 %291  ;;  %v1817_v52 = vpop.xlane.xlu1 %293 }
 0x103   : > { %2720 = vst [vmem:[#allocation27_spill] sm:$0xff] %v1815_v43  ;;  %2721 = vst [vmem:[#allocation28_spill] sm:$0xff] %v1817_v52  ;;  %v358_v62 = vadd.f32 %v357_v57, %v327_v40  ;;  %v329_v63 = vmul.f32 %v1815_v43, %v1815_v43  ;;  %v330_v50 = vmul.f32 %v1817_v52, %v1817_v52 }
 0x105   : > { %v359_v53 = vadd.f32 %v358_v62, %v328_v54 }
 0x106   : > { %v296_v61 = vpop.xlane.xlu0 %295  ;;  %v298_v1 = vpop.xlane.xlu1 %297 }
 0x107   : > { %v360_v49 = vadd.f32 %v359_v53, %v329_v63  ;;  %v331_v46 = vmul.f32 %v296_v61, %v296_v61  ;;  %v332_v27 = vmul.f32 %v298_v1, %v298_v1 }
 0x109   : > { %v361_v58 = vadd.f32 %v360_v49, %v330_v50 }
 0x10a   : > { %v1823_v45 = vpop.xlane.xlu0 %299  ;;  %v1825_v24 = vpop.xlane.xlu1 %301 }
 0x10b   : > { %v362_v19 = vadd.f32 %v361_v58, %v331_v46  ;;  %v333_v57 = vmul.f32 %v1823_v45, %v1823_v45  ;;  %v334_v54 = vmul.f32 %v1825_v24, %v1825_v24 }
 0x10d   : > { %v363_v40 = vadd.f32 %v362_v19, %v332_v27 }
 0x10f   : > { %v364_v62 = vadd.f32 %v363_v40, %v333_v57 }
 0x111   : > { %v365_v52 = vadd.f32 %v364_v62, %v334_v54 }
 0x113   : > { %v366_v43 = vrot.slane %v365_v52, 4 }
 0x115   : > { %v367_v42 = vadd.f32 %v366_v43, %v365_v52 }
 0x117   : > { %v368_v53 = vrot.slane %v367_v42, 2 }
 0x119   : > { %v369_v63 = vadd.f32 %v368_v53, %v367_v42 }
 0x11b   : > { %v370_v49 = vrot.slane %v369_v63, 1 }
 0x11d   : > { %v371_v50 = vadd.f32 %v370_v49, %v369_v63 }
 0x11f   : > { %v372_v60 = vmax.f32 %v371_v50, 1e-24 }
 0x121   : > { %1282 = vrsqrt.f32 %v372_v60 }
 0x12b   : > { %v1831_v41 = vpop.eup %1282 }
 0x12c   : > { %v1834_v46 = vmul.f32 %v1831_v41, %v296_v61  ;;  %v1837_v19 = vmul.f32 %v1831_v41, %v298_v1  ;;  %v374_v58 = vmul.f32 %v1831_v41, %v1711_v4  ;;  %v375_v43 = vmul.f32 %v1831_v41, %v1715_v8 }
 0x12d   : > { %v376_v42 = vmul.f32 %v1831_v41, %v1713_v7  ;;  %v377_v61 = vmul.f32 %v1831_v41, %v1717_v11  ;;  %v378_v1 = vmul.f32 %v1831_v41, %v1727_v20  ;;  %v379_v4 = vmul.f32 %v1831_v41, %v1729_v23 }
 0x12e   : > { %v406_v52 = vmul.f32 %v374_v58, %v1578_v0  ;;  %v407_v60 = vmul.f32 %v375_v43, %v1591_v5  ;;  %v380_v7 = vmul.f32 %v1831_v41, %v1735_v32  ;;  %v381_v11 = vmul.f32 %v1831_v41, %v1737_v35 }
 0x12f   : > { %v408_v27 = vmul.f32 %v376_v42, %v1585_v2  ;;  %v409_v8 = vmul.f32 %v377_v61, %v1593_v6  ;;  %v410_v54 = vmul.f32 %v378_v1, %v1599_v9  ;;  %v411_v20 = vmul.f32 %v379_v4, %v1601_v10 }
 0x130   : > { %v438_v57 = vadd.f32 %v407_v60, %v406_v52  ;;  %v382_v63 = vmul.f32 %v1831_v41, %v1743_v44  ;;  %v412_v23 = vmul.f32 %v380_v7, %v1607_v13  ;;  %v383_v50 = vmul.f32 %v1831_v41, %v1745_v47 }
 0x131   : > { %v413_v32 = vmul.f32 %v381_v11, %v1609_v14  ;;  %v384_v43 = vmul.f32 %v1831_v41, %v1751_v56  ;;  %v385_v52 = vmul.f32 %v1831_v41, %v1753_v59  ;;  %v386_v61 = vmul.f32 %v1831_v41, %v1759_v15 }
 0x132   : > { %v439_v40 = vadd.f32 %v438_v57, %v408_v27  ;;  %v414_v35 = vmul.f32 %v382_v63, %v1615_v17  ;;  %v415_v44 = vmul.f32 %v383_v50, %v1617_v18  ;;  %v387_v27 = vmul.f32 %v1831_v41, %v1761_v16 }
 0x133   : > { %v416_v47 = vmul.f32 %v384_v43, %v1623_v21  ;;  %v417_v56 = vmul.f32 %v385_v52, %v1625_v22  ;;  %v388_v4 = vmul.f32 %v1831_v41, %v1767_v28  ;;  %v418_v59 = vmul.f32 %v386_v61, %v1631_v25  ;;  %v2724_v61 = vld [vmem:[#allocation13_spill] sm:$0xff] }
 0x134   : > { %v440_v62 = vadd.f32 %v439_v40, %v409_v8  ;;  %v389_v40 = vmul.f32 %v1831_v41, %v1769_v31  ;;  %v419_v15 = vmul.f32 %v387_v27, %v1633_v26  ;;  %v391_v11 = vmul.f32 %v1831_v41, %v1777_v51 }
 0x135   : > { %v420_v16 = vmul.f32 %v388_v4, %v1639_v29  ;;  %v394_v50 = vmul.f32 %v1831_v41, %v1791_v36  ;;  %v2727_v4 = vld [vmem:[#allocation26_spill] sm:$0xff] }
 0x136   : > { %v441_v53 = vadd.f32 %v440_v62, %v410_v54  ;;  %v390_v54 = vmul.f32 %v1831_v41, %v1775_v48  ;;  %v421_v28 = vmul.f32 %v389_v40, %v1641_v30  ;;  %v423_v48 = vmul.f32 %v391_v11, %v1649_v34  ;;  %v2731_v11 = vld [vmem:[#allocation28_spill] sm:$0xff] }
 0x138   : > { %v442_v49 = vadd.f32 %v441_v53, %v411_v20  ;;  %v392_v53 = vmul.f32 %v1831_v41, %v1783_v3  ;;  %v422_v31 = vmul.f32 %v390_v54, %v1647_v33  ;;  %v2730_v54 = vld [vmem:[#allocation16_spill] sm:$0xff] }
 0x13a   : > { %v443_v58 = vadd.f32 %v442_v49, %v412_v23  ;;  %v393_v23 = vmul.f32 %v1831_v41, %v1785_v12  ;;  %v424_v51 = vmul.f32 %v392_v53, %v1655_v37 }
 0x13c   : > { %v444_v42 = vadd.f32 %v443_v58, %v413_v32  ;;  %v395_v58 = vmul.f32 %v1831_v41, %v1793_v39  ;;  %v425_v3 = vmul.f32 %v393_v23, %v1657_v38 }
 0x13e   : > { %v445_v60 = vadd.f32 %v444_v42, %v414_v35  ;;  %v396_v35 = vmul.f32 %v1831_v41, %v1799_v55  ;;  %v2722_v42 = vld [vmem:[#allocation12_spill] sm:$0xff]  ;;  %v427_v36 = vmul.f32 %v395_v58, %v2724_v61 }
 0x13f   : > { %v426_v12 = vmul.f32 %v394_v50, %v2722_v42  ;;  %v2735_v58 = vld [vmem:[#allocation20_spill] sm:$0xff] }
 0x140   : > { %v446_v1 = vadd.f32 %v445_v60, %v415_v44  ;;  %v2723_v44 = vld [vmem:[#allocation24_spill] sm:$0xff] }
 0x141   : > { %v397_v60 = vmul.f32 %v1831_v41, %v2723_v44 }
 0x142   : > { %v447_v57 = vadd.f32 %v446_v1, %v416_v47  ;;  %v2725_v1 = vld [vmem:[#allocation25_spill] sm:$0xff] }
 0x143   : > { %v398_v27 = vmul.f32 %v1831_v41, %v2725_v1  ;;  %v2738_v1 = vld [vmem:[#allocation23_spill] sm:$0xff] }
 0x144   : > { %v448_v8 = vadd.f32 %v447_v57, %v417_v56  ;;  %v2726_v56 = vld [vmem:[#allocation14_spill] sm:$0xff] }
 0x145   : > { %v428_v39 = vmul.f32 %v396_v35, %v2726_v56  ;;  %v405_v35 = vmul.f32 %v1831_v41, %v1825_v24 }
 0x146   : > { %v449_v7 = vadd.f32 %v448_v8, %v418_v59  ;;  %v399_v59 = vmul.f32 %v1831_v41, %v2727_v4  ;;  %v2728_v8 = vld [vmem:[#allocation15_spill] sm:$0xff] }
 0x147   : > { %v429_v55 = vmul.f32 %v397_v60, %v2728_v8  ;;  %v2737_v60 = vld [vmem:[#allocation22_spill] sm:$0xff] }
 0x148   : > { %v450_v62 = vadd.f32 %v449_v7, %v419_v15  ;;  %v2729_v15 = vld [vmem:[#allocation27_spill] sm:$0xff] }
 0x149   : > { %v400_v7 = vmul.f32 %v1831_v41, %v2729_v15 }
 0x14a   : > { %v451_v20 = vadd.f32 %v450_v62, %v420_v16  ;;  %v430_v16 = vmul.f32 %v398_v27, %v2730_v54  ;;  %v437_v27 = vmul.f32 %v405_v35, %v2738_v1 }
 0x14c   : > { %v452_v63 = vadd.f32 %v451_v20, %v421_v28  ;;  %v401_v28 = vmul.f32 %v1831_v41, %v2731_v11  ;;  %v2732_v20 = vld [vmem:[#allocation17_spill] sm:$0xff] }
 0x14d   : > { %v431_v53 = vmul.f32 %v399_v59, %v2732_v20 }
 0x14e   : > { %v453_v49 = vadd.f32 %v452_v63, %v422_v31  ;;  %v2733_v63 = vld [vmem:[#allocation18_spill] sm:$0xff] }
 0x14f   : > { %v432_v23 = vmul.f32 %v400_v7, %v2733_v63 }
 0x150   : > { %v454_v32 = vadd.f32 %v453_v49, %v423_v48  ;;  %v2734_v49 = vld [vmem:[#allocation19_spill] sm:$0xff] }
 0x151   : > { %v433_v50 = vmul.f32 %v401_v28, %v2734_v49 }
 0x152   : > { %v455_v43 = vadd.f32 %v454_v32, %v424_v51  ;;  %v404_v32 = vmul.f32 %v1831_v41, %v1823_v45 }
 0x154   : > { %v456_v52 = vadd.f32 %v455_v43, %v425_v3  ;;  %v434_v3 = vmul.f32 %v1834_v46, %v2735_v58 }
 0x156   : > { %v457_v47 = vadd.f32 %v456_v52, %v426_v12  ;;  %v2736_v12 = vld [vmem:[#allocation21_spill] sm:$0xff] }
 0x157   : > { %v435_v52 = vmul.f32 %v1837_v19, %v2736_v12 }
 0x158   : > { %v458_v57 = vadd.f32 %v457_v47, %v427_v36  ;;  %v436_v36 = vmul.f32 %v404_v32, %v2737_v60 }
 0x15a   : > { %v459_v40 = vadd.f32 %v458_v57, %v428_v39 }
 0x15c   : > { %v460_v62 = vadd.f32 %v459_v40, %v429_v55 }
 0x15e   : > { %v461_v31 = vadd.f32 %v460_v62, %v430_v16 }
 0x160   : > { %v462_v48 = vadd.f32 %v461_v31, %v431_v53 }
 0x162   : > { %v463_v51 = vadd.f32 %v462_v48, %v432_v23 }
 0x164   : > { %v464_v43 = vadd.f32 %v463_v51, %v433_v50 }
 0x166   : > { %v465_v44 = vadd.f32 %v464_v43, %v434_v3 }
 0x168   : > { %v466_v47 = vadd.f32 %v465_v44, %v435_v52 }
 0x16a   : > { %v467_v39 = vadd.f32 %v466_v47, %v436_v36 }
 0x16c   : > { %v468_v57 = vadd.f32 %v467_v39, %v437_v27 }
 0x16e   : > { %v469_v4 = vrot.slane %v468_v57, 4 }
 0x170   : > { %v470_v45 = vadd.f32 %v469_v4, %v468_v57 }
 0x172   : > { %v471_v59 = vrot.slane %v470_v45, 2 }
 0x174   : > { %v472_v55 = vadd.f32 %v471_v59, %v470_v45 }
 0x176   : > { %v473_v46 = vrot.slane %v472_v55, 1 }
 0x178   : > { %v474_v40 = vadd.f32 %v473_v46, %v472_v55 }
 0x17a   : > { %v475_v15 = vmul.f32 %v474_v40, %v474_v40 }
 0x17c   : > { %476 = vadd.xlane.f32.xlu0 %v475_v15 }
 0x209   : > { %v477_v41 = vpop.xlane.xlu0 %476 }
 0x20a   : > { %v478_v24 = vmax.f32 %v477_v41, 1e-24 }
 0x20c   : > { %1284 = vrsqrt.f32 %v478_v24 }
 0x216   : > { %v1285_v19 = vpop.eup %1284 }
 0x217   : > { %v480_v7 = vmul.f32 %v1285_v19, %v474_v40 }
 0x219   : > { %v482_v16 = vmul.f32 %v480_v7, %v1591_v5  ;;  %v481_v62 = vmul.f32 %v480_v7, %v1578_v0  ;;  %v484_v11 = vmul.f32 %v480_v7, %v1593_v6  ;;  %v483_v28 = vmul.f32 %v480_v7, %v1585_v2 }
 0x21a   : > { %v486_v53 = vmul.f32 %v480_v7, %v1601_v10  ;;  %v485_v31 = vmul.f32 %v480_v7, %v1599_v9  ;;  %v488_v23 = vmul.f32 %v480_v7, %v1609_v14  ;;  %v487_v48 = vmul.f32 %v480_v7, %v1607_v13 }
 0x21b   : > { %515 = vadd.xlane.f32.xlu0 %v482_v16  ;;  %513 = vadd.xlane.f32.xlu1 %v481_v62  ;;  %v490_v50 = vmul.f32 %v480_v7, %v1617_v18  ;;  %v489_v51 = vmul.f32 %v480_v7, %v1615_v17  ;;  %v492_v32 = vmul.f32 %v480_v7, %v1625_v22 }
 0x21c   : > { %v491_v3 = vmul.f32 %v480_v7, %v1623_v21  ;;  %v494_v43 = vmul.f32 %v480_v7, %v1633_v26  ;;  %v493_v35 = vmul.f32 %v480_v7, %v1631_v25  ;;  %v496_v52 = vmul.f32 %v480_v7, %v1641_v30 }
 0x21d   : > { %v495_v44 = vmul.f32 %v480_v7, %v1639_v29  ;;  %v498_v36 = vmul.f32 %v480_v7, %v1649_v34  ;;  %v497_v47 = vmul.f32 %v480_v7, %v1647_v33  ;;  %v500_v27 = vmul.f32 %v480_v7, %v1657_v38 }
 0x21e   : > { %v499_v39 = vmul.f32 %v480_v7, %v1655_v37  ;;  %v502_v57 = vmul.f32 %v480_v7, %v2724_v61  ;;  %v501_v4 = vmul.f32 %v480_v7, %v2722_v42  ;;  %v504_v45 = vmul.f32 %v480_v7, %v2728_v8 }
 0x21f   : > { %519 = vadd.xlane.f32.xlu0 %v484_v11  ;;  %517 = vadd.xlane.f32.xlu1 %v483_v28  ;;  %v503_v59 = vmul.f32 %v480_v7, %v2726_v56  ;;  %v506_v55 = vmul.f32 %v480_v7, %v2732_v20  ;;  %v505_v46 = vmul.f32 %v480_v7, %v2730_v54 }
 0x220   : > { %v508_v40 = vmul.f32 %v480_v7, %v2734_v49  ;;  %v507_v15 = vmul.f32 %v480_v7, %v2733_v63  ;;  %v510_v41 = vmul.f32 %v480_v7, %v2736_v12  ;;  %v509_v24 = vmul.f32 %v480_v7, %v2735_v58 }
 0x221   : > { %v512_v19 = vmul.f32 %v480_v7, %v2738_v1  ;;  %v511_v16 = vmul.f32 %v480_v7, %v2737_v60 }
 0x223   : > { %523 = vadd.xlane.f32.xlu0 %v486_v53  ;;  %521 = vadd.xlane.f32.xlu1 %v485_v31 }
 0x227   : > { %527 = vadd.xlane.f32.xlu0 %v488_v23  ;;  %525 = vadd.xlane.f32.xlu1 %v487_v48 }
 0x22b   : > { %531 = vadd.xlane.f32.xlu0 %v490_v50  ;;  %529 = vadd.xlane.f32.xlu1 %v489_v51 }
 0x22f   : > { %535 = vadd.xlane.f32.xlu0 %v492_v32  ;;  %533 = vadd.xlane.f32.xlu1 %v491_v3 }
 0x233   : > { %539 = vadd.xlane.f32.xlu0 %v494_v43  ;;  %537 = vadd.xlane.f32.xlu1 %v493_v35 }
 0x237   : > { %543 = vadd.xlane.f32.xlu0 %v496_v52  ;;  %541 = vadd.xlane.f32.xlu1 %v495_v44 }
 0x23b   : > { %547 = vadd.xlane.f32.xlu0 %v498_v36  ;;  %545 = vadd.xlane.f32.xlu1 %v497_v47 }
 0x23f   : > { %551 = vadd.xlane.f32.xlu0 %v500_v27  ;;  %549 = vadd.xlane.f32.xlu1 %v499_v39 }
 0x243   : > { %555 = vadd.xlane.f32.xlu0 %v502_v57  ;;  %553 = vadd.xlane.f32.xlu1 %v501_v4 }
 0x247   : > { %559 = vadd.xlane.f32.xlu0 %v504_v45  ;;  %557 = vadd.xlane.f32.xlu1 %v503_v59 }
 0x24b   : > { %563 = vadd.xlane.f32.xlu0 %v506_v55  ;;  %561 = vadd.xlane.f32.xlu1 %v505_v46 }
 0x24f   : > { %567 = vadd.xlane.f32.xlu0 %v508_v40  ;;  %565 = vadd.xlane.f32.xlu1 %v507_v15 }
 0x253   : > { %571 = vadd.xlane.f32.xlu0 %v510_v41  ;;  %569 = vadd.xlane.f32.xlu1 %v509_v24 }
 0x257   : > { %575 = vadd.xlane.f32.xlu0 %v512_v19  ;;  %573 = vadd.xlane.f32.xlu1 %v511_v16 }
 0x2a8   : > { %v1965_v62 = vpop.xlane.xlu0 %515  ;;  %v1967_v11 = vpop.xlane.xlu1 %513 }
 0x2a9   : > { %v578_v28 = vmul.f32 %v1965_v62, %v1965_v62  ;;  %v577_v53 = vmul.f32 %v1967_v11, %v1967_v11 }
 0x2ab   : > { %v609_v48 = vadd.f32 %v578_v28, %v577_v53 }
 0x2ac   : > { %v1973_v31 = vpop.xlane.xlu0 %519  ;;  %v1975_v23 = vpop.xlane.xlu1 %517 }
 0x2ad   : > { %v579_v7 = vmul.f32 %v1975_v23, %v1975_v23  ;;  %v580_v50 = vmul.f32 %v1973_v31, %v1973_v31 }
 0x2af   : > { %v610_v51 = vadd.f32 %v609_v48, %v579_v7 }
 0x2b0   : > { %v1981_v32 = vpop.xlane.xlu0 %523  ;;  %v1983_v3 = vpop.xlane.xlu1 %521 }
 0x2b1   : > { %v611_v43 = vadd.f32 %v610_v51, %v580_v50  ;;  %v581_v35 = vmul.f32 %v1983_v3, %v1983_v3  ;;  %v582_v52 = vmul.f32 %v1981_v32, %v1981_v32 }
 0x2b3   : > { %v612_v44 = vadd.f32 %v611_v43, %v581_v35 }
 0x2b4   : > { %v1989_v36 = vpop.xlane.xlu0 %527  ;;  %v1991_v47 = vpop.xlane.xlu1 %525 }
 0x2b5   : > { %v613_v27 = vadd.f32 %v612_v44, %v582_v52  ;;  %v583_v39 = vmul.f32 %v1991_v47, %v1991_v47  ;;  %v584_v57 = vmul.f32 %v1989_v36, %v1989_v36 }
 0x2b7   : > { %v614_v4 = vadd.f32 %v613_v27, %v583_v39 }
 0x2b8   : > { %v1997_v45 = vpop.xlane.xlu0 %531  ;;  %v1999_v59 = vpop.xlane.xlu1 %529 }
 0x2b9   : > { %v615_v55 = vadd.f32 %v614_v4, %v584_v57  ;;  %v585_v46 = vmul.f32 %v1999_v59, %v1999_v59  ;;  %v586_v40 = vmul.f32 %v1997_v45, %v1997_v45 }
 0x2bb   : > { %v616_v15 = vadd.f32 %v615_v55, %v585_v46 }
 0x2bc   : > { %v2005_v41 = vpop.xlane.xlu0 %535  ;;  %v2007_v24 = vpop.xlane.xlu1 %533 }
 0x2bd   : > { %v617_v19 = vadd.f32 %v616_v15, %v586_v40  ;;  %v587_v16 = vmul.f32 %v2007_v24, %v2007_v24  ;;  %v588_v28 = vmul.f32 %v2005_v41, %v2005_v41 }
 0x2bf   : > { %v618_v53 = vadd.f32 %v617_v19, %v587_v16 }
 0x2c0   : > { %v2013_v48 = vpop.xlane.xlu0 %539  ;;  %v2015_v7 = vpop.xlane.xlu1 %537 }
 0x2c1   : > { %v619_v50 = vadd.f32 %v618_v53, %v588_v28  ;;  %v589_v51 = vmul.f32 %v2015_v7, %v2015_v7  ;;  %v590_v43 = vmul.f32 %v2013_v48, %v2013_v48 }
 0x2c3   : > { %v620_v35 = vadd.f32 %v619_v50, %v589_v51 }
 0x2c4   : > { %v2021_v52 = vpop.xlane.xlu0 %543  ;;  %v2023_v44 = vpop.xlane.xlu1 %541 }
 0x2c5   : > { %v621_v27 = vadd.f32 %v620_v35, %v590_v43  ;;  %v591_v39 = vmul.f32 %v2023_v44, %v2023_v44  ;;  %v592_v57 = vmul.f32 %v2021_v52, %v2021_v52 }
 0x2c7   : > { %v622_v4 = vadd.f32 %v621_v27, %v591_v39 }
 0x2c8   : > { %v2029_v55 = vpop.xlane.xlu0 %547  ;;  %v2031_v46 = vpop.xlane.xlu1 %545 }
 0x2c9   : > { %v623_v40 = vadd.f32 %v622_v4, %v592_v57  ;;  %v593_v15 = vmul.f32 %v2031_v46, %v2031_v46  ;;  %v594_v19 = vmul.f32 %v2029_v55, %v2029_v55 }
 0x2cb   : > { %v624_v16 = vadd.f32 %v623_v40, %v593_v15 }
 0x2cc   : > { %v2037_v28 = vpop.xlane.xlu0 %551  ;;  %v2039_v53 = vpop.xlane.xlu1 %549 }
 0x2cd   : > { %v625_v50 = vadd.f32 %v624_v16, %v594_v19  ;;  %v595_v51 = vmul.f32 %v2039_v53, %v2039_v53  ;;  %v596_v43 = vmul.f32 %v2037_v28, %v2037_v28 }
 0x2cf   : > { %v626_v35 = vadd.f32 %v625_v50, %v595_v51 }
 0x2d0   : > { %v2045_v27 = vpop.xlane.xlu0 %555  ;;  %v2047_v39 = vpop.xlane.xlu1 %553 }
 0x2d1   : > { %v627_v57 = vadd.f32 %v626_v35, %v596_v43  ;;  %v597_v4 = vmul.f32 %v2047_v39, %v2047_v39  ;;  %v598_v40 = vmul.f32 %v2045_v27, %v2045_v27 }
 0x2d3   : > { %v628_v15 = vadd.f32 %v627_v57, %v597_v4 }
 0x2d4   : > { %v2053_v19 = vpop.xlane.xlu0 %559  ;;  %v2055_v16 = vpop.xlane.xlu1 %557 }
 0x2d5   : > { %v629_v1 = vadd.f32 %v628_v15, %v598_v40  ;;  %v599_v50 = vmul.f32 %v2055_v16, %v2055_v16  ;;  %v600_v51 = vmul.f32 %v2053_v19, %v2053_v19 }
 0x2d7   : > { %v630_v60 = vadd.f32 %v629_v1, %v599_v50 }
 0x2d8   : > { %v2061_v43 = vpop.xlane.xlu0 %563  ;;  %v2063_v35 = vpop.xlane.xlu1 %561 }
 0x2d9   : > { %2739 = vst [vmem:[#allocation12_spill] sm:$0xff] %v2061_v43  ;;  %2740 = vst [vmem:[#allocation24_spill] sm:$0xff] %v2063_v35  ;;  %v631_v12 = vadd.f32 %v630_v60, %v600_v51  ;;  %v601_v57 = vmul.f32 %v2063_v35, %v2063_v35  ;;  %v602_v4 = vmul.f32 %v2061_v43, %v2061_v43 }
 0x2db   : > { %v632_v58 = vadd.f32 %v631_v12, %v601_v57 }
 0x2dc   : > { %v2069_v40 = vpop.xlane.xlu0 %567  ;;  %v2071_v15 = vpop.xlane.xlu1 %565 }
 0x2dd   : > { %2741 = vst [vmem:[#allocation25_spill] sm:$0xff] %v2069_v40  ;;  %2742 = vst [vmem:[#allocation26_spill] sm:$0xff] %v2071_v15  ;;  %v633_v49 = vadd.f32 %v632_v58, %v602_v4  ;;  %v603_v1 = vmul.f32 %v2071_v15, %v2071_v15  ;;  %v604_v50 = vmul.f32 %v2069_v40, %v2069_v40 }
 0x2df   : > { %v634_v63 = vadd.f32 %v633_v49, %v603_v1 }
 0x2e0   : > { %v572_v60 = vpop.xlane.xlu0 %571  ;;  %v570_v51 = vpop.xlane.xlu1 %569 }
 0x2e1   : > { %v635_v20 = vadd.f32 %v634_v63, %v604_v50  ;;  %v605_v54 = vmul.f32 %v570_v51, %v570_v51  ;;  %v606_v8 = vmul.f32 %v572_v60, %v572_v60 }
 0x2e3   : > { %v636_v56 = vadd.f32 %v635_v20, %v605_v54 }
 0x2e4   : > { %v2077_v43 = vpop.xlane.xlu0 %575  ;;  %v2079_v12 = vpop.xlane.xlu1 %573 }
 0x2e5   : > { %v637_v57 = vadd.f32 %v636_v56, %v606_v8  ;;  %v607_v58 = vmul.f32 %v2079_v12, %v2079_v12  ;;  %v608_v4 = vmul.f32 %v2077_v43, %v2077_v43 }
 0x2e7   : > { %v638_v15 = vadd.f32 %v637_v57, %v607_v58 }
 0x2e9   : > { %v639_v40 = vadd.f32 %v638_v15, %v608_v4 }
 0x2eb   : > { %v640_v49 = vrot.slane %v639_v40, 4 }
 0x2ed   : > { %v641_v1 = vadd.f32 %v640_v49, %v639_v40 }
 0x2ef   : > { %v642_v35 = vrot.slane %v641_v1, 2 }
 0x2f1   : > { %v643_v63 = vadd.f32 %v642_v35, %v641_v1 }
 0x2f3   : > { %v644_v50 = vrot.slane %v643_v63, 1 }
 0x2f5   : > { %v645_v61 = vadd.f32 %v644_v50, %v643_v63 }
 0x2f7   : > { %v646_v54 = vmax.f32 %v645_v61, 1e-24 }
 0x2f9   : > { %1286 = vrsqrt.f32 %v646_v54 }
 0x303   : > { %v2085_v20 = vpop.eup %1286 }
 0x304   : > { %v2088_v56 = vmul.f32 %v2085_v20, %v570_v51  ;;  %v2091_v8 = vmul.f32 %v2085_v20, %v572_v60  ;;  %v648_v57 = vmul.f32 %v2085_v20, %v1967_v11  ;;  %v649_v40 = vmul.f32 %v2085_v20, %v1965_v62 }
 0x305   : > { %v650_v35 = vmul.f32 %v2085_v20, %v1975_v23  ;;  %v651_v51 = vmul.f32 %v2085_v20, %v1973_v31  ;;  %v652_v60 = vmul.f32 %v2085_v20, %v1983_v3  ;;  %v653_v11 = vmul.f32 %v2085_v20, %v1981_v32 }
 0x306   : > { %v680_v61 = vmul.f32 %v648_v57, %v1578_v0  ;;  %v681_v15 = vmul.f32 %v649_v40, %v1591_v5  ;;  %v654_v0 = vmul.f32 %v2085_v20, %v1991_v47  ;;  %v655_v31 = vmul.f32 %v2085_v20, %v1989_v36 }
 0x307   : > { %v682_v58 = vmul.f32 %v650_v35, %v1585_v2  ;;  %v683_v62 = vmul.f32 %v651_v51, %v1593_v6  ;;  %v684_v5 = vmul.f32 %v652_v60, %v1599_v9  ;;  %v685_v3 = vmul.f32 %v653_v11, %v1601_v10 }
 0x308   : > { %v712_v4 = vadd.f32 %v681_v15, %v680_v61  ;;  %v656_v2 = vmul.f32 %v2085_v20, %v1999_v59  ;;  %v686_v32 = vmul.f32 %v654_v0, %v1607_v13  ;;  %v657_v6 = vmul.f32 %v2085_v20, %v1997_v45  ;;  %v2743_v0 = vld [vmem:[#allocation13_spill] sm:$0xff] }
 0x309   : > { %v687_v47 = vmul.f32 %v655_v31, %v1609_v14  ;;  %v658_v9 = vmul.f32 %v2085_v20, %v2007_v24  ;;  %v659_v10 = vmul.f32 %v2085_v20, %v2005_v41  ;;  %v660_v13 = vmul.f32 %v2085_v20, %v2015_v7  ;;  %v2745_v31 = vld [vmem:[#allocation14_spill] sm:$0xff] }
 0x30a   : > { %v713_v49 = vadd.f32 %v712_v4, %v682_v58  ;;  %v688_v36 = vmul.f32 %v656_v2, %v1615_v17  ;;  %v689_v59 = vmul.f32 %v657_v6, %v1617_v18  ;;  %v661_v14 = vmul.f32 %v2085_v20, %v2013_v48  ;;  %v2747_v2 = vld [vmem:[#allocation15_spill] sm:$0xff]  ;;  %v2749_v6 = vld [vmem:[#allocation16_spill] sm:$0xff] }
 0x30b   : > { %v690_v45 = vmul.f32 %v658_v9, %v1623_v21  ;;  %v691_v24 = vmul.f32 %v659_v10, %v1625_v22  ;;  %v662_v17 = vmul.f32 %v2085_v20, %v2023_v44  ;;  %v692_v41 = vmul.f32 %v660_v13, %v1631_v25 }
 0x30c   : > { %v714_v23 = vadd.f32 %v713_v49, %v683_v62  ;;  %v663_v18 = vmul.f32 %v2085_v20, %v2021_v52  ;;  %v693_v7 = vmul.f32 %v661_v14, %v1633_v26  ;;  %v664_v21 = vmul.f32 %v2085_v20, %v2031_v46 }
 0x30d   : > { %v694_v48 = vmul.f32 %v662_v17, %v1639_v29  ;;  %v665_v22 = vmul.f32 %v2085_v20, %v2029_v55  ;;  %v666_v25 = vmul.f32 %v2085_v20, %v2039_v53  ;;  %v667_v26 = vmul.f32 %v2085_v20, %v2037_v28 }
 0x30e   : > { %v715_v1 = vadd.f32 %v714_v23, %v684_v5  ;;  %v695_v44 = vmul.f32 %v663_v18, %v1641_v30  ;;  %v696_v52 = vmul.f32 %v664_v21, %v1647_v33  ;;  %v668_v29 = vmul.f32 %v2085_v20, %v2047_v39  ;;  %v2755_v18 = vld [vmem:[#allocation21_spill] sm:$0xff]  ;;  %v2756_v21 = vld [vmem:[#allocation22_spill] sm:$0xff] }
 0x30f   : > { %v697_v46 = vmul.f32 %v665_v22, %v1649_v34  ;;  %v698_v55 = vmul.f32 %v666_v25, %v1655_v37  ;;  %v669_v30 = vmul.f32 %v2085_v20, %v2045_v27  ;;  %v699_v53 = vmul.f32 %v667_v26, %v1657_v38  ;;  %v2744_v37 = vld [vmem:[#allocation24_spill] sm:$0xff]  ;;  %v2757_v22 = vld [vmem:[#allocation23_spill] sm:$0xff] }
 0x310   : > { %v716_v63 = vadd.f32 %v715_v1, %v685_v3  ;;  %v670_v33 = vmul.f32 %v2085_v20, %v2055_v16  ;;  %v700_v28 = vmul.f32 %v668_v29, %v2722_v42  ;;  %v671_v34 = vmul.f32 %v2085_v20, %v2053_v19  ;;  %v2746_v38 = vld [vmem:[#allocation12_spill] sm:$0xff]  ;;  %v2748_v42 = vld [vmem:[#allocation26_spill] sm:$0xff] }
 0x311   : > { %v701_v39 = vmul.f32 %v669_v30, %v2743_v0  ;;  %v672_v23 = vmul.f32 %v2085_v20, %v2744_v37  ;;  %v673_v1 = vmul.f32 %v2085_v20, %v2746_v38  ;;  %v2193_v30 = vld [vmem:[#allocation3] sm:$0xff]  ;;  %v2213_v37 = vld [vmem:[#allocation3 + $0x38] sm:$0xff] }
 0x312   : > { %v717_v50 = vadd.f32 %v716_v63, %v686_v32  ;;  %v702_v27 = vmul.f32 %v670_v33, %v2745_v31  ;;  %v703_v16 = vmul.f32 %v671_v34, %v2747_v2  ;;  %v674_v63 = vmul.f32 %v2085_v20, %v2748_v42  ;;  %v2205_v34 = vld [vmem:[#allocation3 + $0x28] sm:$0xff]  ;;  %v2217_v31 = vld [vmem:[#allocation3 + $0x30] sm:$0xff] }
 0x313   : > { %v704_v19 = vmul.f32 %v672_v23, %v2749_v6  ;;  %v2233_v42 = vld [vmem:[#allocation3 + $0x50] sm:$0xff]  ;;  %v2237_v6 = vld [vmem:[#allocation3 + $0x68] sm:$0xff] }
 0x314   : > { %v718_v54 = vadd.f32 %v717_v50, %v687_v47  ;;  %v2750_v50 = vld [vmem:[#allocation25_spill] sm:$0xff] }
 0x315   : > { %v675_v9 = vmul.f32 %v2085_v20, %v2750_v50 }
 0x316   : > { %v719_v57 = vadd.f32 %v718_v54, %v688_v36  ;;  %v2751_v36 = vld [vmem:[#allocation17_spill] sm:$0xff] }
 0x317   : > { %v705_v54 = vmul.f32 %v673_v1, %v2751_v36  ;;  %v2225_v1 = vld [vmem:[#allocation3 + $0x40] sm:$0xff] }
 0x318   : > { %v720_v40 = vadd.f32 %v719_v57, %v689_v59  ;;  %v2752_v59 = vld [vmem:[#allocation18_spill] sm:$0xff] }
 0x319   : > { %v706_v57 = vmul.f32 %v674_v63, %v2752_v59  ;;  %v2253_v59 = vld [vmem:[#allocation3 + $0x88] sm:$0xff] }
 0x31a   : > { %v721_v35 = vadd.f32 %v720_v40, %v690_v45  ;;  %v2753_v45 = vld [vmem:[#allocation19_spill] sm:$0xff] }
 0x31b   : > { %v707_v40 = vmul.f32 %v675_v9, %v2753_v45  ;;  %v2245_v9 = vld [vmem:[#allocation3 + $0x78] sm:$0xff] }
 0x31c   : > { %v722_v61 = vadd.f32 %v721_v35, %v691_v24  ;;  %v678_v24 = vmul.f32 %v2085_v20, %v2079_v12  ;;  %v2754_v35 = vld [vmem:[#allocation20_spill] sm:$0xff] }
 0x31d   : > { %v708_v17 = vmul.f32 %v2088_v56, %v2754_v35 }
 0x31e   : > { %v723_v15 = vadd.f32 %v722_v61, %v692_v41  ;;  %v679_v61 = vmul.f32 %v2085_v20, %v2077_v43 }
 0x320   : > { %v724_v51 = vadd.f32 %v723_v15, %v693_v7  ;;  %v709_v7 = vmul.f32 %v2091_v8, %v2755_v18 }
 0x322   : > { %v725_v60 = vadd.f32 %v724_v51, %v694_v48  ;;  %v710_v48 = vmul.f32 %v678_v24, %v2756_v21  ;;  %v2265_v24 = vld [vmem:[#allocation3 + $0x90] sm:$0xff] }
 0x323   : > { %v2281_v21 = vld [vmem:[#allocation3 + $0xb0] sm:$0xff] }
 0x324   : > { %v726_v58 = vadd.f32 %v725_v60, %v695_v44  ;;  %v711_v44 = vmul.f32 %v679_v61, %v2757_v22  ;;  %v2273_v61 = vld [vmem:[#allocation3 + $0xa0] sm:$0xff]  ;;  %2761 = vst [vmem:[#allocation24_spill] sm:$0xff] %v2281_v21 }
 0x325   : > { %2759 = vst [vmem:[#allocation28_spill] sm:$0xff] %v2273_v61 }
 0x326   : > { %v727_v4 = vadd.f32 %v726_v58, %v696_v52 }
 0x328   : > { %v728_v11 = vadd.f32 %v727_v4, %v697_v46 }
 0x32a   : > { %v729_v62 = vadd.f32 %v728_v11, %v698_v55  ;;  %v2189_v55 = vld [vmem:[#allocation3 + $0x8] sm:$0xff] }
 0x32c   : > { %v730_v49 = vadd.f32 %v729_v62, %v699_v53  ;;  %v2197_v62 = vld [vmem:[#allocation3 + $0x18] sm:$0xff] }
 0x32e   : > { %v731_v5 = vadd.f32 %v730_v49, %v700_v28  ;;  %v2201_v28 = vld [vmem:[#allocation3 + $0x10] sm:$0xff] }
 0x330   : > { %v732_v3 = vadd.f32 %v731_v5, %v701_v39  ;;  %v2209_v39 = vld [vmem:[#allocation3 + $0x20] sm:$0xff] }
 0x332   : > { %v733_v32 = vadd.f32 %v732_v3, %v702_v27  ;;  %v2221_v3 = vld [vmem:[#allocation3 + $0x48] sm:$0xff] }
 0x334   : > { %v734_v47 = vadd.f32 %v733_v32, %v703_v16  ;;  %v2229_v16 = vld [vmem:[#allocation3 + $0x58] sm:$0xff] }
 0x336   : > { %v735_v10 = vadd.f32 %v734_v47, %v704_v19  ;;  %v2241_v47 = vld [vmem:[#allocation3 + $0x60] sm:$0xff] }
 0x338   : > { %v736_v13 = vadd.f32 %v735_v10, %v705_v54  ;;  %v2249_v54 = vld [vmem:[#allocation3 + $0x70] sm:$0xff] }
 0x33a   : > { %v737_v14 = vadd.f32 %v736_v13, %v706_v57  ;;  %v2257_v13 = vld [vmem:[#allocation3 + $0x80] sm:$0xff] }
 0x33c   : > { %v738_v41 = vadd.f32 %v737_v14, %v707_v40  ;;  %v2261_v40 = vld [vmem:[#allocation3 + $0x98] sm:$0xff] }
 0x33e   : > { %v739_v15 = vadd.f32 %v738_v41, %v708_v17  ;;  %v2269_v17 = vld [vmem:[#allocation3 + $0xa8] sm:$0xff] }
 0x33f   : > { %2758 = vst [vmem:[#allocation27_spill] sm:$0xff] %v2269_v17 }
 0x340   : > { %v740_v51 = vadd.f32 %v739_v15, %v709_v7  ;;  %v2277_v7 = vld [vmem:[#allocation3 + $0xb8] sm:$0xff] }
 0x341   : > { %2760 = vst [vmem:[#allocation13_spill] sm:$0xff] %v2277_v7 }
 0x342   : > { %v741_v60 = vadd.f32 %v740_v51, %v710_v48  ;;  %v2285_v51 = vld [vmem:[#allocation3 + $0xc8] sm:$0xff] }
 0x343   : > { %2762 = vst [vmem:[#allocation14_spill] sm:$0xff] %v2285_v51 }
 0x344   : > { %v742_v25 = vadd.f32 %v741_v60, %v711_v44  ;;  %v2289_v44 = vld [vmem:[#allocation3 + $0xc0] sm:$0xff] }
 0x345   : > { %2763 = vst [vmem:[#allocation12_spill] sm:$0xff] %v2289_v44 }
 0x346   : > { %v743_v52 = vrot.slane %v742_v25, 4 }
 0x348   : > { %v744_v12 = vadd.f32 %v743_v52, %v742_v25  ;;  %v2293_v25 = vld [vmem:[#allocation3 + $0xd8] sm:$0xff] }
 0x349   : > { %2764 = vst [vmem:[#allocation15_spill] sm:$0xff] %v2293_v25 }
 0x34a   : > { %v745_v58 = vrot.slane %v744_v12, 2 }
 0x34c   : > { %v746_v26 = vadd.f32 %v745_v58, %v744_v12  ;;  %v2297_v12 = vld [vmem:[#allocation3 + $0xd0] sm:$0xff] }
 0x34d   : > { %2765 = vst [vmem:[#allocation26_spill] sm:$0xff] %v2297_v12 }
 0x34e   : > { %v747_v56 = vrot.slane %v746_v26, 1 }
 0x350   : > { %v748_v46 = vadd.f32 %v747_v56, %v746_v26  ;;  %v2301_v26 = vld [vmem:[#allocation3 + $0xe8] sm:$0xff] }
 0x351   : > { %2766 = vst [vmem:[#allocation16_spill] sm:$0xff] %v2301_v26 }
 0x352   : > { %v749_v4 = vmul.f32 %v748_v46, %v748_v46 }
 0x354   : > { %750 = vadd.xlane.f32.xlu1 %v749_v4 }
 0x3e1   : > { %v751_v43 = vpop.xlane.xlu1 %750 }
 0x3e2   : > { %v752_v20 = vmax.f32 %v751_v43, 1e-24  ;;  %v2309_v43 = vld [vmem:[#allocation3 + $0xf8] sm:$0xff] }
 0x3e3   : > { %2768 = vst [vmem:[#allocation17_spill] sm:$0xff] %v2309_v43 }
 0x3e4   : > { %1288 = vrsqrt.f32 %v752_v20 }
 0x3ee   : > { %v1289_v8 = vpop.eup %1288 }
 0x3ef   : > { %v2187_v29 = vmul.f32 %v1289_v8, %v748_v46  ;;  %v2305_v46 = vld [vmem:[#allocation3 + $0xe0] sm:$0xff]  ;;  %v2313_v8 = vld [vmem:[#allocation3 + $0xf0] sm:$0xff] }
 0x3f0   : > { %2767 = vst [vmem:[#allocation25_spill] sm:$0xff] %v2305_v46  ;;  %2769 = vst [vmem:[#allocation18_spill] sm:$0xff] %v2313_v8 }
 0x3f1   : > { %v756_v11 = vmul.f32 %v2189_v55, %v2187_v29  ;;  %v755_v53 = vmul.f32 %v2193_v30, %v2187_v29  ;;  %v758_v33 = vmul.f32 %v2197_v62, %v2187_v29  ;;  %v757_v49 = vmul.f32 %v2201_v28, %v2187_v29 }
 0x3f2   : > { %v760_v0 = vmul.f32 %v2205_v34, %v2187_v29  ;;  %v759_v5 = vmul.f32 %v2209_v39, %v2187_v29  ;;  %v762_v23 = vmul.f32 %v2213_v37, %v2187_v29  ;;  %v761_v27 = vmul.f32 %v2217_v31, %v2187_v29 }
 0x3f3   : > { %789 = vadd.xlane.f32.xlu1 %v756_v11  ;;  %787 = vadd.xlane.f32.xlu0 %v755_v53  ;;  %v764_v38 = vmul.f32 %v2221_v3, %v2187_v29  ;;  %v763_v2 = vmul.f32 %v2225_v1, %v2187_v29  ;;  %v766_v32 = vmul.f32 %v2229_v16, %v2187_v29 }
 0x3f4   : > { %v765_v63 = vmul.f32 %v2233_v42, %v2187_v29  ;;  %v768_v19 = vmul.f32 %v2237_v6, %v2187_v29  ;;  %v767_v50 = vmul.f32 %v2241_v47, %v2187_v29  ;;  %v770_v36 = vmul.f32 %v2245_v9, %v2187_v29 }
 0x3f5   : > { %v769_v10 = vmul.f32 %v2249_v54, %v2187_v29  ;;  %v772_v57 = vmul.f32 %v2253_v59, %v2187_v29  ;;  %v771_v45 = vmul.f32 %v2257_v13, %v2187_v29  ;;  %v774_v14 = vmul.f32 %v2261_v40, %v2187_v29 }
 0x3f6   : > { %v773_v35 = vmul.f32 %v2265_v24, %v2187_v29  ;;  %v776_v41 = vmul.f32 %v2269_v17, %v2187_v29  ;;  %v775_v18 = vmul.f32 %v2273_v61, %v2187_v29  ;;  %v778_v15 = vmul.f32 %v2277_v7, %v2187_v29 }
 0x3f7   : > { %793 = vadd.xlane.f32.xlu1 %v758_v33  ;;  %791 = vadd.xlane.f32.xlu0 %v757_v49  ;;  %v777_v48 = vmul.f32 %v2281_v21, %v2187_v29  ;;  %v780_v22 = vmul.f32 %v2285_v51, %v2187_v29  ;;  %v779_v60 = vmul.f32 %v2289_v44, %v2187_v29 }
 0x3f8   : > { %v782_v52 = vmul.f32 %v2293_v25, %v2187_v29  ;;  %v781_v58 = vmul.f32 %v2297_v12, %v2187_v29  ;;  %v784_v56 = vmul.f32 %v2301_v26, %v2187_v29  ;;  %v783_v4 = vmul.f32 %v2305_v46, %v2187_v29 }
 0x3f9   : > { %v786_v20 = vmul.f32 %v2309_v43, %v2187_v29  ;;  %v785_v11 = vmul.f32 %v2313_v8, %v2187_v29 }
 0x3fb   : > { %797 = vadd.xlane.f32.xlu1 %v760_v0  ;;  %795 = vadd.xlane.f32.xlu0 %v759_v5 }
 0x3ff   : > { %801 = vadd.xlane.f32.xlu1 %v762_v23  ;;  %799 = vadd.xlane.f32.xlu0 %v761_v27 }
 0x403   : > { %805 = vadd.xlane.f32.xlu1 %v764_v38  ;;  %803 = vadd.xlane.f32.xlu0 %v763_v2 }
 0x407   : > { %809 = vadd.xlane.f32.xlu1 %v766_v32  ;;  %807 = vadd.xlane.f32.xlu0 %v765_v63 }
 0x40b   : > { %813 = vadd.xlane.f32.xlu1 %v768_v19  ;;  %811 = vadd.xlane.f32.xlu0 %v767_v50 }
 0x40f   : > { %817 = vadd.xlane.f32.xlu1 %v770_v36  ;;  %815 = vadd.xlane.f32.xlu0 %v769_v10 }
 0x413   : > { %821 = vadd.xlane.f32.xlu1 %v772_v57  ;;  %819 = vadd.xlane.f32.xlu0 %v771_v45 }
 0x417   : > { %825 = vadd.xlane.f32.xlu1 %v774_v14  ;;  %823 = vadd.xlane.f32.xlu0 %v773_v35 }
 0x41b   : > { %829 = vadd.xlane.f32.xlu1 %v776_v41  ;;  %827 = vadd.xlane.f32.xlu0 %v775_v18 }
 0x41f   : > { %833 = vadd.xlane.f32.xlu1 %v778_v15  ;;  %831 = vadd.xlane.f32.xlu0 %v777_v48 }
 0x423   : > { %837 = vadd.xlane.f32.xlu1 %v780_v22  ;;  %835 = vadd.xlane.f32.xlu0 %v779_v60 }
 0x427   : > { %841 = vadd.xlane.f32.xlu1 %v782_v52  ;;  %839 = vadd.xlane.f32.xlu0 %v781_v58 }
 0x42b   : > { %845 = vadd.xlane.f32.xlu1 %v784_v56  ;;  %843 = vadd.xlane.f32.xlu0 %v783_v4 }
 0x42f   : > { %849 = vadd.xlane.f32.xlu1 %v786_v20  ;;  %847 = vadd.xlane.f32.xlu0 %v785_v11 }
 0x480   : > { %v2317_v53 = vpop.xlane.xlu1 %789  ;;  %v2319_v33 = vpop.xlane.xlu0 %787 }
 0x481   : > { %v852_v49 = vmul.f32 %v2317_v53, %v2317_v53  ;;  %v851_v0 = vmul.f32 %v2319_v33, %v2319_v33 }
 0x483   : > { %v883_v27 = vadd.f32 %v852_v49, %v851_v0 }
 0x484   : > { %v2325_v5 = vpop.xlane.xlu1 %793  ;;  %v2327_v23 = vpop.xlane.xlu0 %791 }
 0x485   : > { %v853_v29 = vmul.f32 %v2327_v23, %v2327_v23  ;;  %v854_v38 = vmul.f32 %v2325_v5, %v2325_v5 }
 0x487   : > { %v884_v2 = vadd.f32 %v883_v27, %v853_v29 }
 0x488   : > { %v2333_v32 = vpop.xlane.xlu1 %797  ;;  %v2335_v63 = vpop.xlane.xlu0 %795 }
 0x489   : > { %v885_v19 = vadd.f32 %v884_v2, %v854_v38  ;;  %v855_v50 = vmul.f32 %v2335_v63, %v2335_v63  ;;  %v856_v36 = vmul.f32 %v2333_v32, %v2333_v32 }
 0x48b   : > { %v886_v10 = vadd.f32 %v885_v19, %v855_v50 }
 0x48c   : > { %v2341_v57 = vpop.xlane.xlu1 %801  ;;  %v2343_v45 = vpop.xlane.xlu0 %799 }
 0x48d   : > { %v887_v14 = vadd.f32 %v886_v10, %v856_v36  ;;  %v857_v35 = vmul.f32 %v2343_v45, %v2343_v45  ;;  %v858_v41 = vmul.f32 %v2341_v57, %v2341_v57 }
 0x48f   : > { %v888_v18 = vadd.f32 %v887_v14, %v857_v35 }
 0x490   : > { %v2349_v15 = vpop.xlane.xlu1 %805  ;;  %v2351_v48 = vpop.xlane.xlu0 %803 }
 0x491   : > { %v889_v22 = vadd.f32 %v888_v18, %v858_v41  ;;  %v859_v60 = vmul.f32 %v2351_v48, %v2351_v48  ;;  %v860_v52 = vmul.f32 %v2349_v15, %v2349_v15 }
 0x493   : > { %v890_v58 = vadd.f32 %v889_v22, %v859_v60 }
 0x494   : > { %v2357_v56 = vpop.xlane.xlu1 %809  ;;  %v2359_v4 = vpop.xlane.xlu0 %807 }
 0x495   : > { %v891_v20 = vadd.f32 %v890_v58, %v860_v52  ;;  %v861_v11 = vmul.f32 %v2359_v4, %v2359_v4  ;;  %v862_v49 = vmul.f32 %v2357_v56, %v2357_v56 }
 0x497   : > { %v892_v0 = vadd.f32 %v891_v20, %v861_v11 }
 0x498   : > { %v2365_v27 = vpop.xlane.xlu1 %813  ;;  %v2367_v29 = vpop.xlane.xlu0 %811 }
 0x499   : > { %v893_v38 = vadd.f32 %v892_v0, %v862_v49  ;;  %v863_v2 = vmul.f32 %v2367_v29, %v2367_v29  ;;  %v864_v19 = vmul.f32 %v2365_v27, %v2365_v27 }
 0x49b   : > { %v894_v50 = vadd.f32 %v893_v38, %v863_v2 }
 0x49c   : > { %v2373_v36 = vpop.xlane.xlu1 %817  ;;  %v2375_v10 = vpop.xlane.xlu0 %815 }
 0x49d   : > { %v895_v14 = vadd.f32 %v894_v50, %v864_v19  ;;  %v865_v35 = vmul.f32 %v2375_v10, %v2375_v10  ;;  %v866_v41 = vmul.f32 %v2373_v36, %v2373_v36 }
 0x49f   : > { %v896_v18 = vadd.f32 %v895_v14, %v865_v35 }
 0x4a0   : > { %v2381_v22 = vpop.xlane.xlu1 %821  ;;  %v2383_v60 = vpop.xlane.xlu0 %819 }
 0x4a1   : > { %v897_v52 = vadd.f32 %v896_v18, %v866_v41  ;;  %v867_v58 = vmul.f32 %v2383_v60, %v2383_v60  ;;  %v868_v20 = vmul.f32 %v2381_v22, %v2381_v22 }
 0x4a3   : > { %v898_v11 = vadd.f32 %v897_v52, %v867_v58 }
 0x4a4   : > { %v2389_v49 = vpop.xlane.xlu1 %825  ;;  %v2391_v0 = vpop.xlane.xlu0 %823 }
 0x4a5   : > { %v899_v38 = vadd.f32 %v898_v11, %v868_v20  ;;  %v869_v2 = vmul.f32 %v2391_v0, %v2391_v0  ;;  %v870_v19 = vmul.f32 %v2389_v49, %v2389_v49 }
 0x4a7   : > { %v900_v50 = vadd.f32 %v899_v38, %v869_v2 }
 0x4a8   : > { %v2397_v14 = vpop.xlane.xlu1 %829  ;;  %v2399_v35 = vpop.xlane.xlu0 %827 }
 0x4a9   : > { %v901_v41 = vadd.f32 %v900_v50, %v870_v19  ;;  %v871_v18 = vmul.f32 %v2399_v35, %v2399_v35  ;;  %v872_v52 = vmul.f32 %v2397_v14, %v2397_v14 }
 0x4ab   : > { %v902_v58 = vadd.f32 %v901_v41, %v871_v18 }
 0x4ac   : > { %v2405_v20 = vpop.xlane.xlu1 %833  ;;  %v2407_v11 = vpop.xlane.xlu0 %831 }
 0x4ad   : > { %2770 = vst [vmem:[#allocation19_spill] sm:$0xff] %v2405_v20  ;;  %v903_v43 = vadd.f32 %v902_v58, %v872_v52  ;;  %v873_v38 = vmul.f32 %v2407_v11, %v2407_v11  ;;  %v874_v2 = vmul.f32 %v2405_v20, %v2405_v20 }
 0x4af   : > { %v904_v8 = vadd.f32 %v903_v43, %v873_v38 }
 0x4b0   : > { %v2413_v19 = vpop.xlane.xlu1 %837  ;;  %v2415_v50 = vpop.xlane.xlu0 %835 }
 0x4b1   : > { %2771 = vst [vmem:[#allocation20_spill] sm:$0xff] %v2413_v19  ;;  %2772 = vst [vmem:[#allocation21_spill] sm:$0xff] %v2415_v50  ;;  %v905_v26 = vadd.f32 %v904_v8, %v874_v2  ;;  %v875_v41 = vmul.f32 %v2415_v50, %v2415_v50  ;;  %v876_v18 = vmul.f32 %v2413_v19, %v2413_v19 }
 0x4b3   : > { %v906_v46 = vadd.f32 %v905_v26, %v875_v41 }
 0x4b4   : > { %v2421_v52 = vpop.xlane.xlu1 %841  ;;  %v2423_v58 = vpop.xlane.xlu0 %839 }
 0x4b5   : > { %2773 = vst [vmem:[#allocation22_spill] sm:$0xff] %v2421_v52  ;;  %2774 = vst [vmem:[#allocation23_spill] sm:$0xff] %v2423_v58  ;;  %v907_v25 = vadd.f32 %v906_v46, %v876_v18  ;;  %v877_v43 = vmul.f32 %v2423_v58, %v2423_v58  ;;  %v878_v38 = vmul.f32 %v2421_v52, %v2421_v52 }
 0x4b7   : > { %v908_v12 = vadd.f32 %v907_v25, %v877_v43 }
 0x4b8   : > { %v846_v8 = vpop.xlane.xlu1 %845  ;;  %v844_v2 = vpop.xlane.xlu0 %843 }
 0x4b9   : > { %v909_v51 = vadd.f32 %v908_v12, %v878_v38  ;;  %v879_v44 = vmul.f32 %v844_v2, %v844_v2  ;;  %v880_v7 = vmul.f32 %v846_v8, %v846_v8 }
 0x4bb   : > { %v910_v21 = vadd.f32 %v909_v51, %v879_v44 }
 0x4bc   : > { %v850_v19 = vpop.xlane.xlu1 %849  ;;  %v2429_v26 = vpop.xlane.xlu0 %847 }
 0x4bd   : > { %v911_v41 = vadd.f32 %v910_v21, %v880_v7  ;;  %v881_v46 = vmul.f32 %v2429_v26, %v2429_v26  ;;  %v882_v18 = vmul.f32 %v850_v19, %v850_v19 }
 0x4bf   : > { %v912_v50 = vadd.f32 %v911_v41, %v881_v46 }
 0x4c1   : > { %v913_v58 = vadd.f32 %v912_v50, %v882_v18 }
 0x4c3   : > { %v914_v17 = vrot.slane %v913_v58, 4 }
 0x4c5   : > { %v915_v20 = vadd.f32 %v914_v17, %v913_v58 }
 0x4c7   : > { %v916_v52 = vrot.slane %v915_v20, 2 }
 0x4c9   : > { %v917_v25 = vadd.f32 %v916_v52, %v915_v20 }
 0x4cb   : > { %v918_v43 = vrot.slane %v917_v25, 1 }
 0x4cd   : > { %v919_v61 = vadd.f32 %v918_v43, %v917_v25 }
 0x4cf   : > { %v920_v12 = vmax.f32 %v919_v61, 1e-24 }
 0x4d1   : > { %1290 = vrsqrt.f32 %v920_v12 }
 0x4db   : > { %v2433_v38 = vpop.eup %1290 }
 0x4dc   : > { %v2436_v51 = vmul.f32 %v2433_v38, %v844_v2  ;;  %v2439_v7 = vmul.f32 %v2433_v38, %v846_v8  ;;  %v2442_v21 = vmul.f32 %v2433_v38, %v850_v19  ;;  %v922_v17 = vmul.f32 %v2433_v38, %v2319_v33 }
 0x4dd   : > { %v923_v44 = vmul.f32 %v2433_v38, %v2317_v53  ;;  %v924_v61 = vmul.f32 %v2433_v38, %v2327_v23  ;;  %v925_v52 = vmul.f32 %v2433_v38, %v2325_v5  ;;  %v926_v19 = vmul.f32 %v2433_v38, %v2335_v63 }
 0x4de   : > { %v954_v20 = vmul.f32 %v2193_v30, %v922_v17  ;;  %v927_v33 = vmul.f32 %v2433_v38, %v2333_v32  ;;  %v928_v30 = vmul.f32 %v2433_v38, %v2343_v45  ;;  %v929_v5 = vmul.f32 %v2433_v38, %v2341_v57 }
 0x4df   : > { %v955_v50 = vmul.f32 %v2189_v55, %v923_v44  ;;  %v956_v58 = vmul.f32 %v2201_v28, %v924_v61  ;;  %v957_v53 = vmul.f32 %v2197_v62, %v925_v52  ;;  %v958_v55 = vmul.f32 %v2209_v39, %v926_v19 }
 0x4e0   : > { %v959_v63 = vmul.f32 %v2205_v34, %v927_v33  ;;  %v930_v28 = vmul.f32 %v2433_v38, %v2351_v48  ;;  %v960_v32 = vmul.f32 %v2217_v31, %v928_v30  ;;  %v931_v62 = vmul.f32 %v2433_v38, %v2349_v15  ;;  %v2775_v33 = vld [vmem:[#allocation28_spill] sm:$0xff]  ;;  %v2777_v30 = vld [vmem:[#allocation27_spill] sm:$0xff] }
 0x4e1   : > { %v986_v8 = vadd.f32 %v955_v50, %v954_v20  ;;  %v961_v45 = vmul.f32 %v2213_v37, %v929_v5  ;;  %v932_v39 = vmul.f32 %v2433_v38, %v2359_v4  ;;  %v933_v34 = vmul.f32 %v2433_v38, %v2357_v56  ;;  %v2779_v5 = vld [vmem:[#allocation24_spill] sm:$0xff] }
 0x4e2   : > { %v962_v57 = vmul.f32 %v2225_v1, %v930_v28  ;;  %v963_v48 = vmul.f32 %v2221_v3, %v931_v62  ;;  %v934_v31 = vmul.f32 %v2433_v38, %v2367_v29  ;;  %v935_v37 = vmul.f32 %v2433_v38, %v2365_v27  ;;  %v2781_v28 = vld [vmem:[#allocation13_spill] sm:$0xff] }
 0x4e3   : > { %v987_v2 = vadd.f32 %v986_v8, %v956_v58  ;;  %v964_v15 = vmul.f32 %v2233_v42, %v932_v39  ;;  %v965_v4 = vmul.f32 %v2229_v16, %v933_v34  ;;  %v936_v1 = vmul.f32 %v2433_v38, %v2375_v10  ;;  %v2785_v34 = vld [vmem:[#allocation14_spill] sm:$0xff] }
 0x4e4   : > { %v966_v56 = vmul.f32 %v2241_v47, %v934_v31  ;;  %v937_v3 = vmul.f32 %v2433_v38, %v2373_v36  ;;  %v967_v29 = vmul.f32 %v2237_v6, %v935_v37  ;;  %v938_v42 = vmul.f32 %v2433_v38, %v2383_v60  ;;  %v2786_v31 = vld [vmem:[#allocation26_spill] sm:$0xff]  ;;  %v2787_v37 = vld [vmem:[#allocation15_spill] sm:$0xff] }
 0x4e5   : > { %v988_v23 = vadd.f32 %v987_v2, %v957_v53  ;;  %v968_v27 = vmul.f32 %v2249_v54, %v936_v1  ;;  %v939_v16 = vmul.f32 %v2433_v38, %v2381_v22  ;;  %v940_v47 = vmul.f32 %v2433_v38, %v2391_v0 }
 0x4e6   : > { %v969_v10 = vmul.f32 %v2245_v9, %v937_v3  ;;  %v970_v36 = vmul.f32 %v2257_v13, %v938_v42  ;;  %v941_v6 = vmul.f32 %v2433_v38, %v2389_v49  ;;  %v942_v54 = vmul.f32 %v2433_v38, %v2399_v35 }
 0x4e7   : > { %v989_v41 = vadd.f32 %v988_v23, %v958_v55  ;;  %v971_v60 = vmul.f32 %v2253_v59, %v939_v16  ;;  %v972_v22 = vmul.f32 %v2265_v24, %v940_v47  ;;  %v943_v9 = vmul.f32 %v2433_v38, %v2397_v14  ;;  %v2776_v59 = vld [vmem:[#allocation19_spill] sm:$0xff]  ;;  %v2778_v24 = vld [vmem:[#allocation21_spill] sm:$0xff] }
 0x4e8   : > { %v973_v0 = vmul.f32 %v2261_v40, %v941_v6  ;;  %v944_v13 = vmul.f32 %v2433_v38, %v2407_v11  ;;  %v974_v49 = vmul.f32 %v2775_v33, %v942_v54  ;;  %v945_v2 = vmul.f32 %v2433_v38, %v2776_v59  ;;  %v2780_v40 = vld [vmem:[#allocation20_spill] sm:$0xff] }
 0x4e9   : > { %v990_v46 = vadd.f32 %v989_v41, %v959_v63  ;;  %v975_v35 = vmul.f32 %v2777_v30, %v943_v9  ;;  %v946_v23 = vmul.f32 %v2433_v38, %v2778_v24  ;;  %v947_v41 = vmul.f32 %v2433_v38, %v2780_v40 }
 0x4ea   : > { %v976_v14 = vmul.f32 %v2779_v5, %v944_v13  ;;  %v977_v11 = vmul.f32 %v2781_v28, %v945_v2  ;;  %v952_v1 = vmul.f32 %v2433_v38, %v2429_v26 }
 0x4eb   : > { %v991_v18 = vadd.f32 %v990_v46, %v960_v32  ;;  %v2782_v46 = vld [vmem:[#allocation23_spill] sm:$0xff] }
 0x4ec   : > { %v948_v62 = vmul.f32 %v2433_v38, %v2782_v46 }
 0x4ed   : > { %v992_v25 = vadd.f32 %v991_v18, %v961_v45  ;;  %v2783_v45 = vld [vmem:[#allocation12_spill] sm:$0xff] }
 0x4ee   : > { %v978_v18 = vmul.f32 %v2783_v45, %v946_v23 }
 0x4ef   : > { %v993_v43 = vadd.f32 %v992_v25, %v962_v57  ;;  %v2784_v57 = vld [vmem:[#allocation22_spill] sm:$0xff] }
 0x4f0   : > { %v949_v25 = vmul.f32 %v2433_v38, %v2784_v57 }
 0x4f1   : > { %v994_v12 = vadd.f32 %v993_v43, %v963_v48  ;;  %v979_v48 = vmul.f32 %v2785_v34, %v947_v41 }
 0x4f3   : > { %v995_v17 = vadd.f32 %v994_v12, %v964_v15  ;;  %v980_v15 = vmul.f32 %v2786_v31, %v948_v62 }
 0x4f5   : > { %v996_v44 = vadd.f32 %v995_v17, %v965_v4  ;;  %v981_v4 = vmul.f32 %v2787_v37, %v949_v25 }
 0x4f7   : > { %v997_v61 = vadd.f32 %v996_v44, %v966_v56  ;;  %v2788_v56 = vld [vmem:[#allocation25_spill] sm:$0xff] }
 0x4f8   : > { %v982_v44 = vmul.f32 %v2788_v56, %v2436_v51 }
 0x4f9   : > { %v998_v20 = vadd.f32 %v997_v61, %v967_v29  ;;  %v2789_v29 = vld [vmem:[#allocation16_spill] sm:$0xff] }
 0x4fa   : > { %v983_v61 = vmul.f32 %v2789_v29, %v2439_v7 }
 0x4fb   : > { %v999_v50 = vadd.f32 %v998_v20, %v968_v27  ;;  %v2790_v27 = vld [vmem:[#allocation18_spill] sm:$0xff] }
 0x4fc   : > { %v984_v20 = vmul.f32 %v2790_v27, %v952_v1 }
 0x4fd   : > { %v1000_v52 = vadd.f32 %v999_v50, %v969_v10  ;;  %v2791_v10 = vld [vmem:[#allocation17_spill] sm:$0xff] }
 0x4fe   : > { %v985_v50 = vmul.f32 %v2791_v10, %v2442_v21 }
 0x4ff   : > { %v1001_v19 = vadd.f32 %v1000_v52, %v970_v36 }
 0x501   : > { %v1002_v58 = vadd.f32 %v1001_v19, %v971_v60 }
 0x503   : > { %v1003_v8 = vadd.f32 %v1002_v58, %v972_v22 }
 0x505   : > { %v1004_v53 = vadd.f32 %v1003_v8, %v973_v0 }
 0x507   : > { %v1005_v55 = vadd.f32 %v1004_v53, %v974_v49 }
 0x509   : > { %v1006_v63 = vadd.f32 %v1005_v55, %v975_v35 }
 0x50b   : > { %v1007_v32 = vadd.f32 %v1006_v63, %v976_v14 }
 0x50d   : > { %v1008_v39 = vadd.f32 %v1007_v32, %v977_v11 }
 0x50f   : > { %v1009_v43 = vadd.f32 %v1008_v39, %v978_v18 }
 0x511   : > { %v1010_v12 = vadd.f32 %v1009_v43, %v979_v48 }
 0x513   : > { %v1011_v17 = vadd.f32 %v1010_v12, %v980_v15 }
 0x515   : > { %v1012_v3 = vadd.f32 %v1011_v17, %v981_v4 }
 0x517   : > { %v1013_v42 = vadd.f32 %v1012_v3, %v982_v44 }
 0x519   : > { %v1014_v16 = vadd.f32 %v1013_v42, %v983_v61 }
 0x51b   : > { %v1015_v47 = vadd.f32 %v1014_v16, %v984_v20 }
 0x51d   : > { %v1016_v36 = vadd.f32 %v1015_v47, %v985_v50 }
 0x51f   : > { %v1017_v52 = vrot.slane %v1016_v36, 4 }
 0x521   : > { %v1018_v6 = vadd.f32 %v1017_v52, %v1016_v36 }
 0x523   : > { %v1019_v60 = vrot.slane %v1018_v6, 2 }
 0x525   : > { %v1020_v26 = vadd.f32 %v1019_v60, %v1018_v6 }
 0x527   : > { %v1021_v38 = vrot.slane %v1020_v26, 1 }
 0x529   : > { %v1022_v19 = vadd.f32 %v1021_v38, %v1020_v26 }
 0x52b   : > { %v1023_v51 = vmul.f32 %v1022_v19, %v1022_v19 }
 0x52d   : > { %1024 = vadd.xlane.f32.xlu0 %v1023_v51 }
 0x5ba   : > { %v1025_v54 = vpop.xlane.xlu0 %1024 }
 0x5bb   : > { %v1026_v22 = vmax.f32 %v1025_v54, 1e-24  ;;  %1292 = vrsqrt.f32 %v1025_v54  ;;  %vm1031_vm0 = vcmp.eq.f32.partialorder %v1025_v54, inf  ;;  %v1034_v0 = vand.u32 2147483648, %v1025_v54 }
 0x5bc   : > { %vm1033_vm1 = vcmp.eq.f32.partialorder %v1025_v54, 0.0 }
 0x5bd   : > { %1294 = vrsqrt.f32 %v1026_v22 }
 0x5c5   : > { %v1293_v7 = vpop.eup %1292 }
 0x5c6   : > { %v1030_v58 = vmul.f32 %v1293_v7, %v1025_v54 }
 0x5c7   : > { %v1295_v9 = vpop.eup %1294 }
 0x5c8   : > { %v1028_v21 = vmul.f32 %v1295_v9, %v1022_v19  ;;  %v1032_v8 = vsel %vm1031_vm0, %v1025_v54, %v1030_v58 }
 0x5c9   : > { %v1035_v13 = vsel %vm1033_vm1, %v1034_v0, %v1032_v8 }
 0x5ca   : > { %v1036_v33 = vadd.f32 1e-05, %v1035_v13  ;;  %1041 = vst [vmem:[#allocation7] sm:$0x1] %v1028_v21 }
 0x5cc   : > { %1296 = vrcp.f32 %v1036_v33 }
 0x5d6   : > { %v1297_v49 = vpop.eup %1296 }
 0x5d7   : > { %1040 = vst.msk [vmem:[#allocation2] sm:$0x1] %vm1039_vm2, %v1297_v49 }
 0x5d8 PF: > { %v1460_v59 = vmov 0   ;;  %s1461_s27 = smov [#allocation7]   ;;  %p2792_p9 = scmp.eq.s32.totalorder %s1506_s16, 1 }
 0x5d9   : > { %1330 = vset.pattern.permute.xlu0 %v1460_v59  ;;  %s1130_s28 = sshll.u32 %s1461_s27, 4  ;;  %s1131_s28 = int_to_ptr.vmem [resolvable:$true] %s1130_s28 }
 0x5da   : > { %s1359_s29 = scalar_lea.vmem %s1131_s28, 16  ;;  %s1365_s30 = scalar_lea.vmem %s1131_s28, 32 }
 0x5db   : > { %p1360_p6 = scmp.ne.s32.totalorder %s1131_s28, %s1359_s29  ;;  %p1366_p13 = scmp.lt.s32.totalorder %s1131_s28, %s1131_s28 }
 0x5dc   : > { %p1367_p1 = scmp.lt.s32.totalorder %s1365_s30, %s1359_s29 }
 0x5dd   : > { %p1361_p10 = pnand %p1360_p6, %p2792_p9 }
 0x5de   : > { %v1211_v53 = vld [vmem:[#allocation2] ss:$0 sm:$0xff]  ;;  %p1368_p4 = por %p1367_p1, %p1366_p13 }
 0x5df   : > { %1067 = vperm.xlu0 %1330, %v1211_v53   ;;  %p1362_p11 = pneg %p1361_p10 }
 0x5e1   : > { %p1369_p7 = pnand %p1368_p4, %p1362_p11 }
 0x5e3   : > { %1372 = shalt.err (!%p1369_p7)
}
 0x5e4   : > { %s1373_s6 = scalar_lea.hbm %s2631_s3, 16  ;;  %p2793_p12 = pmov %p2792_p9 }
 0x5e5   : > { %p1374_p8 = scmp.ne.s32.totalorder %s2631_s3, %s1373_s6  ;;  %p1379_p2 = scmp.lt.u32.totalorder %s1373_s6, %s2631_s3 }
 0x5e7   : > { %p1375_p0 = pnand %p1374_p8, %p2793_p12 }
 0x5e9   : > { %p1376_p3 = pneg %p1375_p0 }
 0x5eb   : > { %p1381_p5 = pnand %p1379_p2, %p1376_p3 }
 0x5ed   : > { %1384 = shalt.err (!%p1381_p5)
}
 0x5ee   : > { %p2794_p6 = pmov %p2792_p9  ;;  %s1210_s20 = sshll.u32 %s1506_s16, 7 }
 0x5ef   : > { %s1043_s24 = scalar_lea.vmem [#allocation3], %s1210_s20  ;;  %s1219_s26 = sshll.u32 %s1506_s16, 11 }
 0x5f0   : > { %1226 = dma.vmem_to_hbm [thread:$0]  (%p2794_p6), %s1131_s28, 16, %s2631_s3, [#allocation8]   ;;  %v1044_v2 = vld [vmem:[%s1043_s24] sm:$0xff]  ;;  %v1045_v30 = vld [vmem:[%s1043_s24 + $0x8] sm:$0xff]  ;;  %v1046_v35 = vld [vmem:[%s1043_s24 + $0x10] sm:$0xff] }
 0x5f1   : > { %v1047_v55 = vld [vmem:[%s1043_s24 + $0x18] sm:$0xff]  ;;  %v1048_v24 = vld [vmem:[%s1043_s24 + $0x20] sm:$0xff]  ;;  %v1049_v23 = vld [vmem:[%s1043_s24 + $0x28] sm:$0xff]  ;;  %s1116_s27 = sshll.u32 %s1574_s25, 4  ;;  %s2565_s30 = scalar_lea.hbm %s2630_s2, %s1219_s26  ;;  %s2567_s27 = int_to_ptr.vmem [resolvable:$true] %s1116_s27 }
 0x5f2   : > { %v1050_v5 = vld [vmem:[%s1043_s24 + $0x30] sm:$0xff]  ;;  %v1051_v14 = vld [vmem:[%s1043_s24 + $0x38] sm:$0xff]  ;;  %v1052_v63 = vld [vmem:[%s1043_s24 + $0x40] sm:$0xff]  ;;  %s2583_s4 = scalar_lea.sflag [#allocation5], %s158_s19  ;;  %s1385_s5 = scalar_lea.vmem %s2567_s27, 2048 }
 0x5f3   : > { %v1053_v40 = vld [vmem:[%s1043_s24 + $0x48] sm:$0xff]  ;;  %v1054_v28 = vld [vmem:[%s1043_s24 + $0x50] sm:$0xff]  ;;  %v1055_v11 = vld [vmem:[%s1043_s24 + $0x58] sm:$0xff]  ;;  %p1386_p9 = scmp.ne.s32.totalorder %s2567_s27, %s1385_s5  ;;  %p2795_p10 = scmp.ne.s32.totalorder %s2697_s22, 0 }
 0x5f4   : > { %v1056_v32 = vld [vmem:[%s1043_s24 + $0x60] sm:$0xff]  ;;  %v1057_v46 = vld [vmem:[%s1043_s24 + $0x68] sm:$0xff]  ;;  %v1058_v62 = vld [vmem:[%s1043_s24 + $0x70] sm:$0xff]  ;;  %s1462_s6 = smov [#allocation6]  }
 0x5f5   : > { %v1059_v45 = vld [vmem:[%s1043_s24 + $0x78] sm:$0xff]  ;;  %p1387_p11 = pnand %p1386_p9, %p2795_p10  ;;  %s1389_s7 = sshll.u32 %s1462_s6, 4  ;;  %s1390_s7 = int_to_ptr.vmem [resolvable:$false] %s1389_s7 }
 0x5f6   : > { %s1391_s8 = scalar_lea.vmem %s1390_s7, 4096  ;;  %p1392_p1 = scmp.lt.s32.totalorder %s2567_s27, %s1390_s7 }
 0x5f7   : > { %p1388_p13 = pneg %p1387_p11  ;;  %p1393_p4 = scmp.lt.s32.totalorder %s1391_s8, %s1385_s5 }
 0x5f9   : > { %p1394_p7 = por %p1393_p4, %p1392_p1 }
 0x5fb   : > { %p1395_p8 = pnand %p1394_p7, %p1388_p13 }
 0x65e   : > { %v1068_v41 = vpop.permute.xlu0 %1067 }
 0x65f   : > { %v1070_v18 = vmul.f32 %v1068_v41, %v1044_v2  ;;  %v1071_v39 = vmul.f32 %v1068_v41, %v1045_v30  ;;  %v1072_v57 = vmul.f32 %v1068_v41, %v1046_v35  ;;  %v1073_v25 = vmul.f32 %v1068_v41, %v1047_v55 }
 0x660   : > { %v1074_v34 = vmul.f32 %v1068_v41, %v1048_v24  ;;  %v1075_v48 = vmul.f32 %v1068_v41, %v1049_v23  ;;  %v1076_v43 = vmul.f32 %v1068_v41, %v1050_v5  ;;  %v1077_v31 = vmul.f32 %v1068_v41, %v1051_v14 }
 0x661   : > { %v1078_v15 = vmul.f32 %v1068_v41, %v1052_v63  ;;  %v1079_v12 = vmul.f32 %v1068_v41, %v1053_v40  ;;  %v1080_v37 = vmul.f32 %v1068_v41, %v1054_v28  ;;  %v1081_v4 = vmul.f32 %v1068_v41, %v1055_v11  ;;  %1086 = vst [vmem:[%s1574_s25] sm:$0xff] %v1070_v18 }
 0x662   : > { %1087 = vst [vmem:[%s1574_s25 + $0x8] sm:$0xff] %v1071_v39  ;;  %1088 = vst [vmem:[%s1574_s25 + $0x10] sm:$0xff] %v1072_v57  ;;  %v1082_v17 = vmul.f32 %v1068_v41, %v1056_v32  ;;  %v1083_v1 = vmul.f32 %v1068_v41, %v1057_v46  ;;  %v1084_v56 = vmul.f32 %v1068_v41, %v1058_v62 }
 0x663   : > { %1089 = vst [vmem:[%s1574_s25 + $0x18] sm:$0xff] %v1073_v25  ;;  %v1085_v44 = vmul.f32 %v1068_v41, %v1059_v45  ;;  %1090 = vst [vmem:[%s1574_s25 + $0x20] sm:$0xff] %v1074_v34 }
 0x664   : > { %1091 = vst [vmem:[%s1574_s25 + $0x28] sm:$0xff] %v1075_v48  ;;  %1092 = vst [vmem:[%s1574_s25 + $0x30] sm:$0xff] %v1076_v43 }
 0x665   : > { %1093 = vst [vmem:[%s1574_s25 + $0x38] sm:$0xff] %v1077_v31  ;;  %1094 = vst [vmem:[%s1574_s25 + $0x40] sm:$0xff] %v1078_v15 }
 0x666   : > { %1095 = vst [vmem:[%s1574_s25 + $0x48] sm:$0xff] %v1079_v12  ;;  %1096 = vst [vmem:[%s1574_s25 + $0x50] sm:$0xff] %v1080_v37 }
 0x667   : > { %1097 = vst [vmem:[%s1574_s25 + $0x58] sm:$0xff] %v1081_v4  ;;  %1098 = vst [vmem:[%s1574_s25 + $0x60] sm:$0xff] %v1082_v17 }
 0x668   : > { %1099 = vst [vmem:[%s1574_s25 + $0x68] sm:$0xff] %v1083_v1  ;;  %1100 = vst [vmem:[%s1574_s25 + $0x70] sm:$0xff] %v1084_v56 }
 0x669   : > { %1101 = vst [vmem:[%s1574_s25 + $0x78] sm:$0xff] %v1085_v44 }
 0x66a   : > { %1398 = shalt.err (!%p1395_p8)
}
 0x66b   : > { %s1399_s19 = scalar_lea.hbm %s2565_s30, 2048  ;;  %s1403_s10 = scalar_lea.hbm %s2630_s2, 4096 }
 0x66c   : > { %p1400_p12 = scmp.ne.s32.totalorder %s2565_s30, %s1399_s19  ;;  %p1404_p2 = scmp.lt.u32.totalorder %s2565_s30, %s2630_s2 }
 0x66d   : > { %p1405_p5 = scmp.lt.u32.totalorder %s1403_s10, %s1399_s19  ;;  %p1407_p9 = scmp.lt.u32.totalorder %s1399_s19, %s2565_s30 }
 0x66e   : > { %p1401_p0 = pnand %p1400_p12, %p2795_p10 }
 0x66f   : > { %p1406_p6 = por %p1405_p5, %p1404_p2 }
 0x670   : > { %p1402_p3 = pneg %p1401_p0 }
 0x671   : > { %p1408_p11 = por %p1407_p9, %p1406_p6 }
 0x673   : > { %p1409_p13 = pnand %p1408_p11, %p1402_p3 }
 0x675   : > { %1412 = shalt.err (!%p1409_p13)
}
 0x676   : > { %s1463_s20 = smov 128   ;;  %s1464_s24 = smov 8  }
 0x677   : > { %1224 = dma.vmem_to_hbm [thread:$0]  (%p2795_p10), %s2567_s27, 2048, %s2565_s30, %s2583_s4, %s1463_s20, %s1463_s20, %s1464_s24  }
 0x678   : > { %p2796_p1 = scmp.eq.s32.totalorder %s1506_s16, 1 }
 0x67a   : > { %1434 = dma.done.wait (%p2796_p1), [#allocation8], 16   ;;  %p2797_p4 = pmov %p2796_p1 }
 0x67c   : > { %1436 = vsyncadd (%p2797_p4), [#allocation8], 4294967280 }
 0x67d PF: > { %p1242_p7 = scmp.ge.s32.totalorder %s1455_s15, 2  ;;  %s1146_s26 = sand.u32 1, %s1443_s12  }
 0x67e   : > { %p2798_p8 = scmp.ne.s32.totalorder %s2698_s23, 0  ;;  %s1147_s28 = scalar_lea.sflag [#allocation5], %s1146_s26 }
 0x680   : > { %p1235_p12 = pnand %p1242_p7, %p2798_p8 }
 0x682   : > { %1438 = dma.done.wait (!%p1235_p12), %s1147_s28, 2048  }
 0x683   : > { %1440 = vsyncadd (!%p1235_p12), %s1147_s28, 4294965248  ;;  %p16_p10 = scmp.ge.s32.totalorder %s1510_s18, 4   ;;  %s2799_s12 = smov %s1447_s13 }
 0x684   : > { %s2800_s13 = smov %s1451_s14  ;;  %s2801_s14 = smov %s1521_s21 }
 0x685   : > { %s2802_s15 = smov %s1510_s18  ;;  %18 = sbr.rel (!%p16_p10) target bundleno = 5 (0x5), region = 78 }
 0x68c   :  { %1152 = vsyncpa [#allocation4], 1 }
 0x68d   :  { %1154 = vsyncpa [#allocation4 + $0x1], 1 }
 0x68e   :  { %1155 = vsyncpa [#allocation5], 1 }
 0x68f   :  { %1157 = vsyncpa [#allocation5 + $0x1], 1 }
 0x690   :  { %1158 = vsyncpa [#allocation8], 1 }

</bundles_post_ra>
